<compile_context>
chip_gen: v7x
topology: tpu7x:2x2x1
jax: 0.10.0
libtpu: 0.0.40
codegen_flags: <defaults>
</compile_context>

<pallas_src>
import functools

import jax
import jax.numpy as jnp
from jax.experimental import pallas as pl
from jax.experimental.pallas import tpu as pltpu

_NEG_BIG = -1e30                    # additive mask / running-max init (finite)
_VMEM_LIMIT = 48 * 1024 * 1024      # explicit scoped-VMEM budget (safe on v5e..v7x)


def _round_up(v, m):
    return ((v + m - 1) // m) * m


def _full_spec(a):
    # whole-array (weight) BlockSpec; block index never changes, so the block
    # stays VMEM-resident across grid steps.
    return pl.BlockSpec(a.shape, lambda *_: (0,) * a.ndim)


# ----------------------- host-side weight preprocessing --------------------- #

def _att_mats(att_dst, att_src, heads, out_c):
    # block-diagonal packing of the per-head attention vectors so the per-node
    # alpha coefficients become MXU matmuls inside the projection kernels.
    hc = heads * out_c
    a_dst = jnp.zeros((hc, heads), jnp.float32)      # xl @ a_dst   -> (n, H)
    a_src = jnp.zeros((heads, hc), jnp.float32)      # a_src @ xl^T -> (H, n)
    for h in range(heads):
        a_dst = a_dst.at[h * out_c:(h + 1) * out_c, h].set(att_dst[h])
        a_src = a_src.at[h, h * out_c:(h + 1) * out_c].set(att_src[h])
    return a_dst, a_src


def _block_diag(w, K):
    n, m = w.shape
    out = jnp.zeros((K * n, K * m), w.dtype)
    for k in range(K):
        out = out.at[k * n:(k + 1) * n, k * m:(k + 1) * m].set(w)
    return out


# -------------------- layer-1 projection (post_attn1 + conv1 lin) ----------- #

def _proj1_kernel(x_ref, ex_ref, rootwc_ref, wp_ref, linh_ref, linx_ref,
                  adstw_ref, asrcw_ref, xl_ref, adst_ref, asrct_ref):
    h_x = jnp.dot(x_ref[...], wp_ref[...], preferred_element_type=jnp.float32)
    h_c = jnp.dot(ex_ref[...], rootwc_ref[...], preferred_element_type=jnp.float32)
    g = 0.5 * (jnp.tanh(0.5 * (h_x + h_c)) + 1.0)          # sigmoid on the EUP
    h = g * h_x + (1.0 - g) * h_c
    # x1 = cat(h, h_x); xl = x1 @ lin  (split matmul == cat-then-matmul)
    xl = (jnp.dot(h.astype(jnp.bfloat16), linh_ref[...],
                  preferred_element_type=jnp.float32)
          + jnp.dot(h_x.astype(jnp.bfloat16), linx_ref[...],
                    preferred_element_type=jnp.float32))
    xl_bf = xl.astype(jnp.bfloat16)
    xl_ref[...] = xl_bf
    # per-node alpha coefficients via block-diagonal attention matrices (MXU)
    adst_ref[...] = jnp.dot(xl_bf, adstw_ref[...],
                            preferred_element_type=jnp.float32)          # (n, H)
    asrct_ref[...] = jnp.dot(asrcw_ref[...], xl_bf.T,
                             preferred_element_type=jnp.float32)         # (H, n)


# ---- layer-2 projection (relu + K x post_attn2 fused via block-diag wp) ---- #

def _pa2_proj2_kernel(g1_ref, ex_ref, rootwc_ref, wpbd_ref, linh_ref, linx_ref,
                      adstw_ref, asrcw_ref, xl_ref, adst_ref, asrct_ref, *, K):
    xr = jnp.maximum(g1_ref[...], 0).astype(jnp.bfloat16)   # relu fused in
    # claim-gate projection of root_extend is identical for all K slices.
    h_c = jnp.dot(ex_ref[...], rootwc_ref[...], preferred_element_type=jnp.float32)
    # all K post-gate projections in one block-diagonal matmul
    hx_all = jnp.dot(xr, wpbd_ref[...], preferred_element_type=jnp.float32)
    hc_all = jnp.concatenate([h_c] * K, axis=-1)
    g = 0.5 * (jnp.tanh(0.5 * (hx_all + hc_all)) + 1.0)
    h_all = g * hx_all + (1.0 - g) * hc_all
    # x2 = cat_k(h_k, hx_k); fold straight into the conv2 projection via the
    # host-rearranged lin_h / lin_x blocks.
    xl = (jnp.dot(h_all.astype(jnp.bfloat16), linh_ref[...],
                  preferred_element_type=jnp.float32)
          + jnp.dot(hx_all.astype(jnp.bfloat16), linx_ref[...],
                    preferred_element_type=jnp.float32))
    xl_bf = xl.astype(jnp.bfloat16)
    xl_ref[...] = xl_bf
    adst_ref[...] = jnp.dot(xl_bf, adstw_ref[...],
                            preferred_element_type=jnp.float32)
    asrct_ref[...] = jnp.dot(asrcw_ref[...], xl_bf.T,
                             preferred_element_type=jnp.float32)


def _run_proj(kernel, x_nodes, expand, root_wc, weights, *, hc, heads, tile_n):
    NP, in_dim = x_nodes.shape
    B = expand.shape[1]
    in_specs = ([pl.BlockSpec((tile_n, in_dim), lambda i: (i, 0)),
                 pl.BlockSpec((tile_n, B), lambda i: (i, 0)),
                 _full_spec(root_wc)]
                + [_full_spec(w) for w in weights])
    return pl.pallas_call(
        kernel,
        out_shape=(jax.ShapeDtypeStruct((NP, hc), jnp.bfloat16),
                   jax.ShapeDtypeStruct((NP, heads), jnp.float32),
                   jax.ShapeDtypeStruct((heads, NP), jnp.float32)),
        grid_spec=pltpu.PrefetchScalarGridSpec(
            num_scalar_prefetch=0,
            grid=(NP // tile_n,),
            in_specs=in_specs,
            out_specs=[pl.BlockSpec((tile_n, hc), lambda i: (i, 0)),
                       pl.BlockSpec((tile_n, heads), lambda i: (i, 0)),
                       pl.BlockSpec((heads, tile_n), lambda i: (0, i))]),
        compiler_params=pltpu.CompilerParams(
            dimension_semantics=("parallel",),
            vmem_limit_bytes=_VMEM_LIMIT),
    )(x_nodes, expand, root_wc, *weights)


# -------------------- tiled GAT attention (flash-style online softmax) ------ #

def _gat_attn_kernel(adst_ref, asrc_ref, xl_ref, msk_ref, b_ref, o_ref,
                     m_ref, l_ref, acc_ref, *, heads, out_c, concat):
    j = pl.program_id(1)

    @pl.when(j == 0)
    def _():
        m_ref[...] = jnp.full(m_ref.shape, _NEG_BIG, jnp.float32)
        l_ref[...] = jnp.zeros_like(l_ref)
        acc_ref[...] = jnp.zeros_like(acc_ref)

    # additive mask precomputed on the host (0 on edges, ~-1e30 elsewhere),
    # shared by all heads; row gate makes fully-masked src tiles contribute 0.
    mask_bias = msk_ref[...].astype(jnp.float32)                      # (tn, ts)
    row_gate = (jnp.max(mask_bias, axis=-1, keepdims=True) > -1.0
                ).astype(jnp.float32)                                 # (tn, 1)

    adst = adst_ref[...]          # (tn, H)  sum(x_i * att_dst_h), precomputed
    asrc = asrc_ref[...]          # (H, ts)  sum(x_j * att_src_h), precomputed
    xl = xl_ref[...]              # (ts, H*C) projected source features (bf16)
    m_prev = m_ref[...]
    l_prev = l_ref[...]
    ts = xl.shape[0]
    ones_col = jnp.ones((ts, 1), xl.dtype)

    m_cols, l_cols = [], []
    for h in range(heads):
        # appended ones column -> the p row-sum rides along on the MXU matmul
        xh_aug = jnp.concatenate(
            [xl[:, h * out_c:(h + 1) * out_c], ones_col], axis=-1)
        s = adst[:, h:h + 1] + asrc[h:h + 1, :]                       # (tn, ts)
        s = jnp.maximum(s, 0.2 * s) + mask_bias                       # leaky + mask
        m_h = jnp.maximum(m_prev[:, h:h + 1],
                          jnp.max(s, axis=-1, keepdims=True))
        a_h = jnp.exp(m_prev[:, h:h + 1] - m_h)
        p = jnp.exp(s - m_h)                    # masked lanes underflow to 0
        part = jnp.dot(p.astype(xl.dtype), xh_aug,
                       preferred_element_type=jnp.float32) * row_gate  # (tn, C+1)
        # per-head in-place accumulator update (short live ranges, no big concat)
        acc_ref[h] = a_h * acc_ref[h] + part[:, :out_c]
        m_cols.append(m_h)
        l_cols.append(a_h * l_prev[:, h:h + 1] + part[:, out_c:out_c + 1])
    m_ref[...] = jnp.concatenate(m_cols, axis=-1)
    l_ref[...] = jnp.concatenate(l_cols, axis=-1)

    @pl.when(j == pl.num_programs(1) - 1)
    def _():
        inv_l = pl.reciprocal(l_ref[...], approx=True)                # (tn, H)
        if concat:
            parts = [acc_ref[h] * inv_l[:, h:h + 1] for h in range(heads)]
            o_ref[...] = (jnp.concatenate(parts, axis=-1)
                          + b_ref[...]).astype(o_ref.dtype)
        else:
            mean = acc_ref[0] * inv_l[:, 0:1]
            for h in range(1, heads):
                mean = mean + acc_ref[h] * inv_l[:, h:h + 1]
            o_ref[...] = (mean * (1.0 / heads) + b_ref[...]).astype(o_ref.dtype)


def gat_attention(xl, adst, asrc_t, adj_bias, bias, *, heads, out_c, concat,
                  tile_n, tile_s, out_dtype):
    NP = xl.shape[0]
    hc = heads * out_c
    out_dim = hc if concat else out_c
    kernel = functools.partial(_gat_attn_kernel, heads=heads, out_c=out_c,
                               concat=concat)
    return pl.pallas_call(
        kernel,
        out_shape=jax.ShapeDtypeStruct((NP, out_dim), out_dtype),
        grid_spec=pltpu.PrefetchScalarGridSpec(
            num_scalar_prefetch=0,
            grid=(NP // tile_n, NP // tile_s),
            in_specs=[pl.BlockSpec((tile_n, heads), lambda i, j: (i, 0)),   # adst
                      pl.BlockSpec((heads, tile_s), lambda i, j: (0, j)),   # asrc^T
                      pl.BlockSpec((tile_s, hc), lambda i, j: (j, 0)),      # xl (src)
                      pl.BlockSpec((tile_n, tile_s), lambda i, j: (i, j)),  # adj bias
                      pl.BlockSpec((1, out_dim), lambda i, j: (0, 0))],     # conv bias
            out_specs=pl.BlockSpec((tile_n, out_dim), lambda i, j: (i, 0)),
            scratch_shapes=[pltpu.VMEM((tile_n, heads), jnp.float32),       # m
                            pltpu.VMEM((tile_n, heads), jnp.float32),       # l
                            pltpu.VMEM((heads, tile_n, out_c), jnp.float32)]),  # acc
        compiler_params=pltpu.CompilerParams(
            dimension_semantics=("parallel", "arbitrary"),
            vmem_limit_bytes=_VMEM_LIMIT),
    )(adst, asrc_t, xl, adj_bias, bias)


# ------------------------------ readout kernels ----------------------------- #

def _root_embed_kernel(x_ref, sel_ref, o_ref):
    @pl.when(pl.program_id(0) == 0)
    def _():
        o_ref[...] = jnp.zeros_like(o_ref)
    o_ref[...] += jnp.dot(sel_ref[...], jnp.maximum(x_ref[...], 0.0),
                          preferred_element_type=jnp.float32)


def _readout_kernel(x_ref, ex_ref, mean_ref, re_ref, wfc_ref, bfc_ref,
                    wclf_ref, bclf_ref, o_ref, shat_ref, s_ref, *, out_feats):
    i = pl.program_id(0)

    @pl.when(i == 0)
    def _():
        shat_ref[...] = jnp.zeros_like(shat_ref)
        s_ref[...] = jnp.zeros_like(s_ref)

    f = out_feats
    xr = jnp.maximum(x_ref[...], 0.0)
    h_c = jnp.dot(ex_ref[...].astype(jnp.float32), re_ref[...],
                  preferred_element_type=jnp.float32)
    h_prod = xr * h_c
    h_diff = jnp.abs(h_c - xr)
    wfc = wfc_ref[...]                       # (4F, F): split == cat-then-matmul
    hj = (jnp.dot(h_c, wfc[0:f], preferred_element_type=jnp.float32)
          + jnp.dot(xr, wfc[f:2 * f], preferred_element_type=jnp.float32)
          + jnp.dot(h_prod, wfc[2 * f:3 * f], preferred_element_type=jnp.float32)
          + jnp.dot(h_diff, wfc[3 * f:4 * f], preferred_element_type=jnp.float32)
          + bfc_ref[...])
    hj = jnp.tanh(hj)
    mx = jnp.max(hj, axis=-1, keepdims=True)
    e = jnp.exp(hj - mx)
    beta = e * pl.reciprocal(jnp.sum(e, axis=-1, keepdims=True), approx=True)
    mean_t = mean_ref[...]
    shat_ref[...] += jnp.dot(mean_t, beta * xr, preferred_element_type=jnp.float32)
    s_ref[...] += jnp.dot(mean_t, xr, preferred_element_type=jnp.float32)

    @pl.when(i == pl.num_programs(0) - 1)
    def _():
        wclf = wclf_ref[...]
        logits = (jnp.dot(shat_ref[...], wclf[0:f],
                          preferred_element_type=jnp.float32)
                  + jnp.dot(s_ref[...], wclf[f:2 * f],
                            preferred_element_type=jnp.float32)
                  + bclf_ref[...])
        lm = jnp.max(logits, axis=-1, keepdims=True)
        lz = logits - lm
        o_ref[...] = lz - jnp.log(jnp.sum(jnp.exp(lz), axis=-1, keepdims=True))


def readout(x, sel, expand, meanmat, wfc, bfc, wclf, bclf, *, out_feats, tile_n):
    NP, F = x.shape
    B = sel.shape[0]
    num_class = wclf.shape[1]
    # pass 1: per-graph root embedding (node-tiled accumulator)
    root_embed = pl.pallas_call(
        _root_embed_kernel,
        out_shape=jax.ShapeDtypeStruct((B, F), jnp.float32),
        grid_spec=pltpu.PrefetchScalarGridSpec(
            num_scalar_prefetch=0,
            grid=(NP // tile_n,),
            in_specs=[pl.BlockSpec((tile_n, F), lambda i: (i, 0)),
                      pl.BlockSpec((B, tile_n), lambda i: (0, i))],
            out_specs=pl.BlockSpec((B, F), lambda i: (0, 0))),
        compiler_params=pltpu.CompilerParams(
            dimension_semantics=("arbitrary",),
            vmem_limit_bytes=_VMEM_LIMIT),
    )(x, sel)
    # pass 2: node-tiled gated scatter-mean + classifier head
    kernel = functools.partial(_readout_kernel, out_feats=out_feats)
    return pl.pallas_call(
        kernel,
        out_shape=jax.ShapeDtypeStruct((B, num_class), jnp.float32),
        grid_spec=pltpu.PrefetchScalarGridSpec(
            num_scalar_prefetch=0,
            grid=(NP // tile_n,),
            in_specs=[pl.BlockSpec((tile_n, F), lambda i: (i, 0)),
                      pl.BlockSpec((tile_n, B), lambda i: (i, 0)),
                      pl.BlockSpec((B, tile_n), lambda i: (0, i)),
                      _full_spec(root_embed), _full_spec(wfc), _full_spec(bfc),
                      _full_spec(wclf), _full_spec(bclf)],
            out_specs=pl.BlockSpec((B, num_class), lambda i: (0, 0)),
            scratch_shapes=[pltpu.VMEM((B, F), jnp.float32),
                            pltpu.VMEM((B, F), jnp.float32)]),
        compiler_params=pltpu.CompilerParams(
            dimension_semantics=("arbitrary",),
            vmem_limit_bytes=_VMEM_LIMIT),
    )(x, expand, meanmat, root_embed, wfc, bfc, wclf, bclf)


# ------------------------------ Full forward ------------------------------- #

def chgat_forward(params, data, *, hid_feats, out_feats, K=4,
                  node_tile=256, src_tile=512, pad_nodes_to=0):
    assert src_tile % node_tile == 0
    x, root, adj = data["x"], data["root"], data["adj"]
    expand, sel, meanmat = data["expand"], data["sel"], data["meanmat"]
    N = x.shape[0]
    bf16 = jnp.bfloat16

    # pad node dimension to a multiple of both tile sizes
    NP = _round_up(max(N, pad_nodes_to, src_tile), src_tile)
    pad = NP - N
    x_bf = jnp.pad(x.astype(jnp.float32), ((0, pad), (0, 0))).astype(bf16)
    expand_bf = jnp.pad(expand.astype(jnp.float32), ((0, pad), (0, 0))).astype(bf16)
    sel_p = jnp.pad(sel.astype(jnp.float32), ((0, 0), (0, pad)))
    meanmat_p = jnp.pad(meanmat.astype(jnp.float32), ((0, 0), (0, pad)))
    adj_p = jnp.pad(adj.astype(jnp.float32), ((0, pad), (0, pad)))
    if pad:
        idx = jnp.arange(NP)
        pad_diag = (idx[:, None] == idx[None, :]) & (idx[:, None] >= N)
        adj_p = jnp.where(pad_diag, 1.0, adj_p)   # self-loops for padded rows
    # additive attention mask precomputed in bf16 (halves the dominant HBM stream)
    adj_bias = jnp.where(adj_p > 0.0, 0.0, _NEG_BIG).astype(bf16)

    hc1, hc2 = K * hid_feats, K * out_feats

    # ---- layer 1: fused post_attn1 + conv1 projection + alphas, then attention
    a1_dst, a1_srcT = _att_mats(params["c1_adst"], params["c1_asrc"], K, hid_feats)
    w1 = [params["pa1_wp"].astype(bf16),
          params["c1_lin"][:hid_feats].astype(bf16),
          params["c1_lin"][hid_feats:].astype(bf16),
          a1_dst.astype(bf16), a1_srcT.astype(bf16)]
    root_wc1 = (root.astype(jnp.float32) @ params["pa1_wc"]).astype(bf16)
    xl1, adst1, asrc1_t = _run_proj(_proj1_kernel, x_bf, expand_bf, root_wc1, w1,
                                    hc=hc1, heads=K, tile_n=node_tile)
    g1 = gat_attention(xl1, adst1, asrc1_t, adj_bias,
                       params["c1_bias"].reshape(1, -1).astype(jnp.float32),
                       heads=K, out_c=hid_feats, concat=True,
                       tile_n=node_tile, tile_s=src_tile, out_dtype=bf16)

    # ---- layer 2: fused relu + K x post_attn2 (block-diag) + conv2 proj + alphas
    a2_dst, a2_srcT = _att_mats(params["c2_adst"], params["c2_asrc"], K, out_feats)
    lin2 = params["c2_lin"]
    lin2_h = jnp.concatenate(
        [lin2[2 * k * hid_feats:(2 * k + 1) * hid_feats] for k in range(K)], axis=0)
    lin2_x = jnp.concatenate(
        [lin2[(2 * k + 1) * hid_feats:(2 * k + 2) * hid_feats] for k in range(K)],
        axis=0)
    w2 = [_block_diag(params["pa2_wp"], K).astype(bf16),
          lin2_h.astype(bf16), lin2_x.astype(bf16),
          a2_dst.astype(bf16), a2_srcT.astype(bf16)]
    root_wc2 = (root.astype(jnp.float32) @ params["pa2_wc"]).astype(bf16)
    kernel2 = functools.partial(_pa2_proj2_kernel, K=K)
    xl2, adst2, asrc2_t = _run_proj(kernel2, g1, expand_bf, root_wc2, w2,
                                    hc=hc2, heads=K, tile_n=node_tile)
    g2 = gat_attention(xl2, adst2, asrc2_t, adj_bias,
                       params["c2_bias"].reshape(1, -1).astype(jnp.float32),
                       heads=K, out_c=out_feats, concat=False,
                       tile_n=node_tile, tile_s=src_tile, out_dtype=jnp.float32)

    # ---- readout (two node-tiled passes; padded nodes have zero weight)
    return readout(g2, sel_p, expand_bf, meanmat_p,
                   params["fc_w"].astype(jnp.float32),
                   params["fc_b"].reshape(1, -1).astype(jnp.float32),
                   params["clf_w"].astype(jnp.float32),
                   params["clf_b"].reshape(1, -1).astype(jnp.float32),
                   out_feats=out_feats, tile_n=node_tile)


# --------------------------- Pure-JAX reference ----------------------------- #

def _ref_post_attn(xp, xc, wp, wc):
    h_x = xp @ wp
    h_c = xc @ wc
    g = jax.nn.sigmoid(h_x + h_c)
    h = g * h_x + (1.0 - g) * h_c
    return jnp.concatenate([h, h_x], axis=-1)


def _ref_gat(x, lin_w, asrc, adst, bias, adj, heads, out_c, concat):
    xl = x @ lin_w
    outs = []
    for h in range(heads):
        xh = xl[:, h * out_c:(h + 1) * out_c]
        alpha_src = xh @ asrc[h]
        alpha_dst = xh @ adst[h]
        s = alpha_dst[:, None] + alpha_src[None, :]
        s = jnp.where(s >= 0.0, s, 0.2 * s)
        s = jnp.where(adj > 0.0, s, -1e30)
        s = s - jnp.max(s, axis=-1, keepdims=True)
        e = jnp.where(adj > 0.0, jnp.exp(s), 0.0)
        p = e / jnp.sum(e, axis=-1, keepdims=True)
        outs.append(p @ xh)
    if concat:
        return jnp.concatenate(outs, axis=-1) + bias
    return sum(outs) / float(heads) + bias


def _ref_readout(x, sel, expand, meanmat, wfc, bfc, wclf, bclf):
    x = jnp.maximum(x, 0.0)
    root_embed = sel @ x
    h_c = expand @ root_embed
    h_prod = x * h_c
    h_diff = jnp.abs(h_c - x)
    hj = jnp.tanh(jnp.concatenate([h_c, x, h_prod, h_diff], axis=-1) @ wfc + bfc)
    beta = jax.nn.softmax(hj, axis=-1)
    s_hat = meanmat @ (beta * x)
    s = meanmat @ x
    logits = jnp.concatenate([s_hat, s], axis=-1) @ wclf + bclf
    return jax.nn.log_softmax(logits, axis=-1)


def ref_forward(params, data, *, hid_feats, out_feats, K=4):
    x, root, adj = data["x"], data["root"], data["adj"]
    expand, sel, meanmat = data["expand"], data["sel"], data["meanmat"]
    root_extend = expand @ root
    x1 = _ref_post_attn(x, root_extend, params["pa1_wp"], params["pa1_wc"])
    g1 = _ref_gat(x1, params["c1_lin"], params["c1_asrc"], params["c1_adst"],
                  params["c1_bias"], adj, K, hid_feats, True)
    xr = jnp.maximum(g1, 0.0)
    h_list = [
        _ref_post_attn(xr[:, k * hid_feats:(k + 1) * hid_feats], root_extend,
                       params["pa2_wp"], params["pa2_wc"])
        for k in range(K)
    ]
    x2 = jnp.concatenate(h_list, axis=-1)
    g2 = _ref_gat(x2, params["c2_lin"], params["c2_asrc"], params["c2_adst"],
                  params["c2_bias"], adj, K, out_feats, False)
    return _ref_readout(g2, sel, expand, meanmat, params["fc_w"], params["fc_b"],
                        params["clf_w"], params["clf_b"])


# ------------------------------- Param init --------------------------------- #

def init_params(key, in_feats, hid_feats, out_feats, num_class=4, K=4):
    keys = jax.random.split(key, 16)

    def w(k, shape, scale=None):
        s = scale if scale is not None else 1.0 / float(shape[0]) ** 0.5
        return jax.random.normal(k, shape, jnp.float32) * s

    return dict(
        pa1_wp=w(keys[0], (in_feats, hid_feats)),
        pa1_wc=w(keys[1], (in_feats, hid_feats)),
        c1_lin=w(keys[2], (2 * hid_feats, K * hid_feats)),
        c1_asrc=w(keys[3], (K, hid_feats)),
        c1_adst=w(keys[4], (K, hid_feats)),
        c1_bias=w(keys[5], (K * hid_feats,), scale=0.1),
        pa2_wp=w(keys[6], (hid_feats, hid_feats)),
        pa2_wc=w(keys[7], (in_feats, hid_feats)),
        c2_lin=w(keys[8], (8 * hid_feats, K * out_feats)),
        c2_asrc=w(keys[9], (K, out_feats)),
        c2_adst=w(keys[10], (K, out_feats)),
        c2_bias=w(keys[11], (out_feats,), scale=0.1),
        fc_w=w(keys[12], (4 * out_feats, out_feats)),
        fc_b=w(keys[13], (out_feats,), scale=0.1),
        clf_w=w(keys[14], (2 * out_feats, num_class)),
        clf_b=w(keys[15], (num_class,), scale=0.1),
    )


# ----------------------------------- Main ----------------------------------- #

if __name__ == "__main__":
    in_feats, hid_feats, out_feats, num_class, K = 16, 8, 8, 4, 4
    N, B = 8, 2

    key = jax.random.PRNGKey(0)
    kx, kp = jax.random.split(key)
    x = jax.random.normal(kx, (N, in_feats), jnp.float32)

    # Two small trees: graph 0 = nodes 0..4 (root 0), graph 1 = nodes 5..7 (root 5).
    batch = jnp.array([0, 0, 0, 0, 0, 1, 1, 1], jnp.int32)
    ptr = jnp.array([0, 5, 8], jnp.int32)
    rootindex = jnp.array([0, 5], jnp.int32)
    root = x[rootindex]                                     # (B, in_feats)

    td_src = jnp.array([0, 0, 1, 2, 5, 5], jnp.int32)       # TD edge_index
    td_dst = jnp.array([1, 2, 3, 4, 6, 7], jnp.int32)
    src = jnp.concatenate([td_src, td_dst])                 # merged = cat(TD, BU)
    dst = jnp.concatenate([td_dst, td_src])
    adj = jnp.zeros((N, N), jnp.float32).at[dst, src].set(1.0)
    adj = jnp.minimum(adj + jnp.eye(N, dtype=jnp.float32), 1.0)   # add self loops

    expand = jax.nn.one_hot(batch, B, dtype=jnp.float32)          # (N, B)
    sel = jnp.zeros((B, N), jnp.float32).at[jnp.arange(B), ptr[:-1]].set(1.0)
    counts = jnp.sum(expand, axis=0)
    meanmat = (expand / counts[None, :]).T                        # (B, N) scatter_mean

    params = init_params(kp, in_feats, hid_feats, out_feats, num_class, K)
    data = dict(x=x, root=root, adj=adj, expand=expand, sel=sel, meanmat=meanmat)

    # pad to 1024 nodes so the attention kernel runs a real (4 x 2) grid: 256-wide
    # dst tiles (parallel axis of even length for v7x's two TensorCores) by
    # 512-wide src tiles (exercising the online softmax across src blocks).
    out = chgat_forward(params, data, hid_feats=hid_feats, out_feats=out_feats,
                        K=K, node_tile=256, src_tile=512, pad_nodes_to=1024)
    out = jax.block_until_ready(out)

    ref = ref_forward(params, data, hid_feats=hid_feats, out_feats=out_feats, K=K)
    assert out.shape == (B, num_class)
    assert bool(jnp.all(jnp.isfinite(out)))
    # bf16 matmul operands in the kernels -> looser tolerance vs the f32 reference
    assert bool(jnp.allclose(out, ref, atol=5e-2, rtol=5e-2)), (out, ref)
    print("KERNEL_OK")
</pallas_src>

<mosaic_0001>
module attributes {stable_mosaic.version = 11 : i64} {
  func.func @_proj1_kernel(%arg0: i32, %arg1: memref<256x16xbf16, #tpu.memory_space<vmem>>, %arg2: memref<256x2xbf16, #tpu.memory_space<vmem>>, %arg3: memref<2x8xbf16, #tpu.memory_space<vmem>>, %arg4: memref<16x8xbf16, #tpu.memory_space<vmem>>, %arg5: memref<8x32xbf16, #tpu.memory_space<vmem>>, %arg6: memref<8x32xbf16, #tpu.memory_space<vmem>>, %arg7: memref<32x4xbf16, #tpu.memory_space<vmem>>, %arg8: memref<4x32xbf16, #tpu.memory_space<vmem>>, %arg9: memref<256x32xbf16, #tpu.memory_space<vmem>>, %arg10: memref<256x4xf32, #tpu.memory_space<vmem>>, %arg11: memref<4x256xf32, #tpu.memory_space<vmem>>) attributes {dimension_semantics = [#tpu.dimension_semantics<parallel>], iteration_bounds = array<i64: 4>, scalar_prefetch = 0 : i64, scratch_operands = 0 : i64, tpu.core_type = #tpu.core_type<tc>, window_params = [{transform_indices = @transform_0, window_bounds = array<i64: 256, 16>}, {transform_indices = @transform_1, window_bounds = array<i64: 256, 2>}, {pipeline_mode = #tpu.pipeline_mode<synchronous>, transform_indices = @transform_2, window_bounds = array<i64: 2, 8>}, {pipeline_mode = #tpu.pipeline_mode<synchronous>, transform_indices = @transform_3, window_bounds = array<i64: 16, 8>}, {pipeline_mode = #tpu.pipeline_mode<synchronous>, transform_indices = @transform_4, window_bounds = array<i64: 8, 32>}, {pipeline_mode = #tpu.pipeline_mode<synchronous>, transform_indices = @transform_5, window_bounds = array<i64: 8, 32>}, {pipeline_mode = #tpu.pipeline_mode<synchronous>, transform_indices = @transform_6, window_bounds = array<i64: 32, 4>}, {pipeline_mode = #tpu.pipeline_mode<synchronous>, transform_indices = @transform_7, window_bounds = array<i64: 4, 32>}, {transform_indices = @transform_8, window_bounds = array<i64: 256, 32>}, {transform_indices = @transform_9, window_bounds = array<i64: 256, 4>}, {transform_indices = @transform_10, window_bounds = array<i64: 4, 256>}]} {
    %c0 = arith.constant 0 : index
    %c0_0 = arith.constant 0 : index
    %0 = vector.load %arg1[%c0, %c0_0] : memref<256x16xbf16, #tpu.memory_space<vmem>>, vector<256x16xbf16>
    %c0_1 = arith.constant 0 : index
    %c0_2 = arith.constant 0 : index
    %1 = vector.load %arg4[%c0_1, %c0_2] : memref<16x8xbf16, #tpu.memory_space<vmem>>, vector<16x8xbf16>
    %cst = arith.constant dense<0.000000e+00> : vector<256x8xf32>
    %2 = tpu.matmul %0, %1, %cst {dimension_numbers = #tpu.dot_dimension_numbers<[1], [0], [0], [1], [0, 0, 1, 1], [], []>} : vector<256x16xbf16>, vector<16x8xbf16>, vector<256x8xf32> -> vector<256x8xf32>
    %c0_3 = arith.constant 0 : index
    %c0_4 = arith.constant 0 : index
    %3 = vector.load %arg2[%c0_3, %c0_4] : memref<256x2xbf16, #tpu.memory_space<vmem>>, vector<256x2xbf16>
    %c0_5 = arith.constant 0 : index
    %c0_6 = arith.constant 0 : index
    %4 = vector.load %arg3[%c0_5, %c0_6] : memref<2x8xbf16, #tpu.memory_space<vmem>>, vector<2x8xbf16>
    %cst_7 = arith.constant dense<0.000000e+00> : vector<256x8xf32>
    %5 = tpu.matmul %3, %4, %cst_7 {dimension_numbers = #tpu.dot_dimension_numbers<[1], [0], [0], [1], [0, 0, 1, 1], [], []>} : vector<256x2xbf16>, vector<2x8xbf16>, vector<256x8xf32> -> vector<256x8xf32>
    %6 = arith.addf %2, %5 : vector<256x8xf32>
    %cst_8 = arith.constant 5.000000e-01 : f32
    %7 = vector.broadcast %cst_8 : f32 to vector<256x8xf32>
    %8 = arith.mulf %7, %6 : vector<256x8xf32>
    %9 = math.tanh %8 : vector<256x8xf32>
    %cst_9 = arith.constant 1.000000e+00 : f32
    %10 = vector.broadcast %cst_9 : f32 to vector<256x8xf32>
    %11 = arith.addf %9, %10 : vector<256x8xf32>
    %cst_10 = arith.constant 5.000000e-01 : f32
    %12 = vector.broadcast %cst_10 : f32 to vector<256x8xf32>
    %13 = arith.mulf %12, %11 : vector<256x8xf32>
    %14 = arith.mulf %13, %2 : vector<256x8xf32>
    %cst_11 = arith.constant 1.000000e+00 : f32
    %15 = vector.broadcast %cst_11 : f32 to vector<256x8xf32>
    %16 = arith.subf %15, %13 : vector<256x8xf32>
    %17 = arith.mulf %16, %5 : vector<256x8xf32>
    %18 = arith.addf %14, %17 : vector<256x8xf32>
    %19 = arith.truncf %18 : vector<256x8xf32> to vector<256x8xbf16>
    %c0_12 = arith.constant 0 : index
    %c0_13 = arith.constant 0 : index
    %20 = vector.load %arg5[%c0_12, %c0_13] : memref<8x32xbf16, #tpu.memory_space<vmem>>, vector<8x32xbf16>
    %cst_14 = arith.constant dense<0.000000e+00> : vector<256x32xf32>
    %21 = tpu.matmul %19, %20, %cst_14 {dimension_numbers = #tpu.dot_dimension_numbers<[1], [0], [0], [1], [0, 0, 1, 1], [], []>} : vector<256x8xbf16>, vector<8x32xbf16>, vector<256x32xf32> -> vector<256x32xf32>
    %22 = arith.truncf %2 : vector<256x8xf32> to vector<256x8xbf16>
    %c0_15 = arith.constant 0 : index
    %c0_16 = arith.constant 0 : index
    %23 = vector.load %arg6[%c0_15, %c0_16] : memref<8x32xbf16, #tpu.memory_space<vmem>>, vector<8x32xbf16>
    %cst_17 = arith.constant dense<0.000000e+00> : vector<256x32xf32>
    %24 = tpu.matmul %22, %23, %cst_17 {dimension_numbers = #tpu.dot_dimension_numbers<[1], [0], [0], [1], [0, 0, 1, 1], [], []>} : vector<256x8xbf16>, vector<8x32xbf16>, vector<256x32xf32> -> vector<256x32xf32>
    %25 = arith.addf %21, %24 : vector<256x32xf32>
    %26 = arith.truncf %25 : vector<256x32xf32> to vector<256x32xbf16>
    %c0_18 = arith.constant 0 : index
    %c0_19 = arith.constant 0 : index
    %27 = vector.load %arg9[%c0_18, %c0_19] : memref<256x32xbf16, #tpu.memory_space<vmem>>, vector<256x32xbf16>
    tpu.vector_store %arg9[%c0_18, %c0_19], %26 {strides = array<i32>} : memref<256x32xbf16, #tpu.memory_space<vmem>>, vector<256x32xbf16>,
    %c0_20 = arith.constant 0 : index
    %c0_21 = arith.constant 0 : index
    %28 = vector.load %arg7[%c0_20, %c0_21] : memref<32x4xbf16, #tpu.memory_space<vmem>>, vector<32x4xbf16>
    %cst_22 = arith.constant dense<0.000000e+00> : vector<256x4xf32>
    %29 = tpu.matmul %26, %28, %cst_22 {dimension_numbers = #tpu.dot_dimension_numbers<[1], [0], [0], [1], [0, 0, 1, 1], [], []>} : vector<256x32xbf16>, vector<32x4xbf16>, vector<256x4xf32> -> vector<256x4xf32>
    %c0_23 = arith.constant 0 : index
    %c0_24 = arith.constant 0 : index
    %30 = vector.load %arg10[%c0_23, %c0_24] : memref<256x4xf32, #tpu.memory_space<vmem>>, vector<256x4xf32>
    tpu.vector_store %arg10[%c0_23, %c0_24], %29 {strides = array<i32>} : memref<256x4xf32, #tpu.memory_space<vmem>>, vector<256x4xf32>,
    %c0_25 = arith.constant 0 : index
    %c0_26 = arith.constant 0 : index
    %31 = vector.load %arg8[%c0_25, %c0_26] : memref<4x32xbf16, #tpu.memory_space<vmem>>, vector<4x32xbf16>
    %32 = tpu.transpose %26, [1, 0] : vector<256x32xbf16> -> vector<32x256xbf16>
    %cst_27 = arith.constant dense<0.000000e+00> : vector<4x256xf32>
    %33 = tpu.matmul %31, %32, %cst_27 {dimension_numbers = #tpu.dot_dimension_numbers<[1], [0], [0], [1], [0, 0, 1, 1], [], []>} : vector<4x32xbf16>, vector<32x256xbf16>, vector<4x256xf32> -> vector<4x256xf32>
    %c0_28 = arith.constant 0 : index
    %c0_29 = arith.constant 0 : index
    %34 = vector.load %arg11[%c0_28, %c0_29] : memref<4x256xf32, #tpu.memory_space<vmem>>, vector<4x256xf32>
    tpu.vector_store %arg11[%c0_28, %c0_29], %33 {strides = array<i32>} : memref<4x256xf32, #tpu.memory_space<vmem>>, vector<4x256xf32>,
    return
  }
  func.func @transform_0(%arg0: i32) -> (i32, i32) {
    %c0_i32 = arith.constant 0 : i32
    %c0_i32_0 = arith.constant 0 : i32
    return %arg0, %c0_i32 : i32, i32
  }
  func.func @transform_1(%arg0: i32) -> (i32, i32) {
    %c0_i32 = arith.constant 0 : i32
    %c0_i32_0 = arith.constant 0 : i32
    return %arg0, %c0_i32 : i32, i32
  }
  func.func @transform_2(%arg0: i32) -> (i32, i32) {
    %c0_i32 = arith.constant 0 : i32
    %c0_i32_0 = arith.constant 0 : i32
    %c0_i32_1 = arith.constant 0 : i32
    return %c0_i32, %c0_i32_0 : i32, i32
  }
  func.func @transform_3(%arg0: i32) -> (i32, i32) {
    %c0_i32 = arith.constant 0 : i32
    %c0_i32_0 = arith.constant 0 : i32
    %c0_i32_1 = arith.constant 0 : i32
    return %c0_i32, %c0_i32_0 : i32, i32
  }
  func.func @transform_4(%arg0: i32) -> (i32, i32) {
    %c0_i32 = arith.constant 0 : i32
    %c0_i32_0 = arith.constant 0 : i32
    %c0_i32_1 = arith.constant 0 : i32
    return %c0_i32, %c0_i32_0 : i32, i32
  }
  func.func @transform_5(%arg0: i32) -> (i32, i32) {
    %c0_i32 = arith.constant 0 : i32
    %c0_i32_0 = arith.constant 0 : i32
    %c0_i32_1 = arith.constant 0 : i32
    return %c0_i32, %c0_i32_0 : i32, i32
  }
  func.func @transform_6(%arg0: i32) -> (i32, i32) {
    %c0_i32 = arith.constant 0 : i32
    %c0_i32_0 = arith.constant 0 : i32
    %c0_i32_1 = arith.constant 0 : i32
    return %c0_i32, %c0_i32_0 : i32, i32
  }
  func.func @transform_7(%arg0: i32) -> (i32, i32) {
    %c0_i32 = arith.constant 0 : i32
    %c0_i32_0 = arith.constant 0 : i32
    %c0_i32_1 = arith.constant 0 : i32
    return %c0_i32, %c0_i32_0 : i32, i32
  }
  func.func @transform_8(%arg0: i32) -> (i32, i32) {
    %c0_i32 = arith.constant 0 : i32
    %c0_i32_0 = arith.constant 0 : i32
    return %arg0, %c0_i32 : i32, i32
  }
  func.func @transform_9(%arg0: i32) -> (i32, i32) {
    %c0_i32 = arith.constant 0 : i32
    %c0_i32_0 = arith.constant 0 : i32
    return %arg0, %c0_i32 : i32, i32
  }
  func.func @transform_10(%arg0: i32) -> (i32, i32) {
    %c0_i32 = arith.constant 0 : i32
    %c0_i32_0 = arith.constant 0 : i32
    return %c0_i32, %arg0 : i32, i32
  }
}

</mosaic_0001>

<bundles_post_ra>
// kernel: tpu_custom_call.1
= control target key start
LH: loop header
LB: loop body
LE: loop exit
PB: predicated region body
PF: predicated region fallthrough
CT: control target
= control target key end

     0   :  { %16 = vsyncpa [#allocation3], 0  ;;  %s4014_s0 = inlined_call_operand.vmem [shape: bf16[1024,16], index: 0, kind: input, shape index: {}]   ;;  %s4015_s1 = inlined_call_operand.vmem [shape: bf16[1024,2], index: 1, kind: input, shape index: {}]   ;;  %s4016_s2 = inlined_call_operand.vmem [shape: bf16[2,8], index: 2, kind: input, shape index: {}]   ;;  %s4017_s3 = inlined_call_operand.vmem [shape: bf16[16,8], index: 3, kind: input, shape index: {}]   ;;  %s4018_s4 = inlined_call_operand.vmem [shape: bf16[8,32], index: 4, kind: input, shape index: {}]   ;;  %s4019_s5 = inlined_call_operand.vmem [shape: bf16[8,32], index: 5, kind: input, shape index: {}]   ;;  %s4020_s6 = inlined_call_operand.vmem [shape: bf16[32,4], index: 6, kind: input, shape index: {}]   ;;  %s4021_s7 = inlined_call_operand.vmem [shape: bf16[4,32], index: 7, kind: input, shape index: {}]   ;;  %s4022_s8 = inlined_call_operand.vmem [shape: bf16[1024,32], index: 8, kind: output, shape index: {0}]   ;;  %s4023_s9 = inlined_call_operand.vmem [shape: f32[1024,4], index: 9, kind: output, shape index: {1}]   ;;  %s4024_s10 = inlined_call_operand.hbm [shape: f32[4,1024], index: 10, kind: output, shape index: {2}]  }
   0x1   :  { %18 = vsyncpa [#allocation3 + $0x1], 0  ;;  %s3218_s13 = smov 0   ;;  %s3220_s14 = smov 0  }
   0x2   :  { %s3222_s15 = smov 0   ;;  %s3224_s16 = smov 0  }
   0x3 LB: > { %s3239_s17 = sadd.s32 4294967295, %s3160_s16   ;;  %s2440_s18 = sadd.s32 4294967294, %s3160_s16   ;;  %s3160_s16 = sphi %s3224_s16, %s4033_s16   ;;  %s3156_s15 = sphi %s3222_s15, %s4032_s15   ;;  %s3152_s14 = sphi %s3220_s14, %s4031_s14   ;;  %s3148_s13 = sphi %s3218_s13, %s4030_s13  }
   0x4   : > { %s3243_s19 = sadd.s32 1, %s3160_s16   ;;  %s261_s20 = sadd.s32 1, %s3156_s15 }
   0x5   : > { %s258_s21 = ssub.s32 %s3160_s16, %s3243_s19  ;;  %p271_p0 = scmp.ne.s32.totalorder %s3156_s15, %s3152_s14 }
   0x6   : > { %p259_p1 = scmp.eq.s32.totalorder %s258_s21, 0  ;;  %p272_p2 = scmp.eq.s32.totalorder %s3239_s17, 3 }
   0x7   : > { %p277_p3 = scmp.ne.s32.totalorder %s3152_s14, %s3148_s13  ;;  %p278_p4 = scmp.eq.s32.totalorder %s2440_s18, 3 }
   0x8   : > { %s3254_s22 = scalar_select %p259_p1, %s3156_s15, %s261_s20  }
   0x9   : > { %p3256_p5 = por %p272_p2, %p271_p0  ;;  %p3260_p6 = por %p278_p4, %p277_p3 }
   0xa   : > { %p2443_p7 = scmp.ge.s32.totalorder %s3160_s16, 1  ;;  %p332_p8 = scmp.lt.s32.totalorder %s3160_s16, 5 }
   0xc   : > { %p333_p9 = pnand %p2443_p7, %p332_p8 }
   0xd   : > { %v2999_v0 = vld [vmem:[%s4017_s3] sm:$0xff] (!%p333_p9)   ;;  %s2445_s27 = sshll.u32 (!%p333_p9), %s3239_s17, 5  ;;  %vm903_vm0 = vcmask (!%p333_p9), 1040384   ;;  %vm1439_vm1 = vcmask (!%p333_p9), 1043456   ;;  %vm531_vm2 = vcmask (!%p333_p9), 130048   ;;  %vm854_vm3 = vcmask (!%p333_p9), 15360  }
   0xe   : > { %336 = sbr.rel (%p333_p9) target bundleno = 853 (0x355), region = 52  ;;  %p386_p10 = scmp.lt.s32.totalorder (!%p333_p9), %s2445_s27, 127  ;;  %v773_v1 = vld [vmem:[%s4016_s2] sm:$0x1] (!%p333_p9)  ;;  %2743 = vmatprep.subr.bf16.mxu0 (!%p333_p9), %v2999_v0  ;;  %2915 = vmatprep.subr.bf16.mxu1 (!%p333_p9), %v2999_v0  ;;  %vm1390_vm4 = vcmask (!%p333_p9), 64512   ;;  %vm1944_vm5 = vcmask (!%p333_p9), 257024  }
   0xf   : > { %v1389_v2 = vld [vmem:[%s4019_s5] sm:$0xf] (!%p333_p9)  ;;  %2744 = vmatpush3.bf16.msra.mxu0 (!%p333_p9), %v2999_v0  ;;  %2916 = vmatpush3.bf16.msra.mxu1 (!%p333_p9), %v2999_v0  ;;  %v905_v8 = vsel (!%p333_p9), %vm903_vm0, %v773_v1, 0  ;;  %vm1993_vm6 = vcmask (!%p333_p9), 261120   ;;  %vm2203_vm7 = vcmask (!%p333_p9), 31744   ;;  %s2638_s25 = sshll.u32 (!%p333_p9), %s3239_s17, 7 }
  0x10   : > { %2949 = vmatprep.subr.msk.bf16.mxu1 (!%p333_p9), %vm903_vm0, %v773_v1  ;;  %2950 = vmatprep.subr.msk.bf16.mxu0 (!%p333_p9), %vm1439_vm1, %v1389_v2  ;;  %v1441_v6 = vsel (!%p333_p9), %vm1439_vm1, %v1389_v2, 0  ;;  %v1372_v37 = vld [vmem:[%s4018_s4] sm:$0xf] (!%p333_p9)  ;;  %s3162_s18 = smov (!%p333_p9), [#allocation2]  }
  0x11   : > { %v3032_v41 = vld [vmem:[%s4020_s6] sm:$0xff] (!%p333_p9)   ;;  %v1653_v50 = vsel (!%p333_p9), %vm1439_vm1, %v1372_v37, 0 }
  0x15   : > { %s4035_s27 = smov (!%p386_p10, %s2445_s27), 127 }
  0x16   : > { %s3281_s12 = sshll.u32 %s4035_s27, 2  ;;  %s2452_s30 = sshll.u32 %s4035_s27, 3 }
  0x17   : > { %s3287_s21 = scalar_lea.vmem %s4014_s0, %s3281_s12  ;;  %s3311_s28 = scalar_lea.vmem %s4015_s1, %s3281_s12 }
  0x18   : > { %v3000_v3 = vld [vmem:[%s3287_s21] sm:$0xff]   ;;  %v3001_v4 = vld [vmem:[%s3287_s21 + $0x50] sm:$0xff]   ;;  %v3002_v5 = vld [vmem:[%s3287_s21 + $0x8] sm:$0xff]   ;;  %s3901_s20 = scalar_lea.vmem %s4023_s9, %s2452_s30  ;;  %s382_s27 = sand.u32 1, %s3152_s14  }
  0x19   : > { %2745 = vmatprep.mubr.msk.bf16.mxu0 %vm531_vm2, %v3000_v3  ;;  %2765 = vmatprep.mubr.msk.bf16.mxu1 %vm531_vm2, %v3001_v4  ;;  %v3003_v7 = vld [vmem:[%s3287_s21 + $0x58] sm:$0xff]   ;;  %v3004_v9 = vld [vmem:[%s3287_s21 + $0x10] sm:$0xff]   ;;  %v3005_v10 = vld [vmem:[%s3287_s21 + $0x60] sm:$0xff]   ;;  %s3972_s30 = scalar_lea.hbm %s4024_s10, %s2638_s25  ;;  %s2297_s11 = scalar_lea.sflag [#allocation3], %s382_s27 }
  0x1a   : > { %2746 = vmatmul.mubr.msk.bf16.vlgmr.msra.gmra.mrb[0].mxu0 %vm531_vm2, %v3002_v5  ;;  %2766 = vmatmul.mubr.msk.bf16.vlgmr.msra.gmra.mrb[0].mxu1 %vm531_vm2, %v3003_v7  ;;  %v3006_v11 = vld [vmem:[%s3287_s21 + $0x18] sm:$0xff]   ;;  %v3007_v12 = vld [vmem:[%s3287_s21 + $0x68] sm:$0xff]   ;;  %v3008_v13 = vld [vmem:[%s3287_s21 + $0x20] sm:$0xff]  }
  0x1b   : > { %2812 = vmatpush3.bf16.msra.mxu0 %v1441_v6  ;;  %2749 = vmatprep.mubr.msk.bf16.mxu0 %vm531_vm2, %v3004_v9  ;;  %v3009_v14 = vld [vmem:[%s3287_s21 + $0x70] sm:$0xff]   ;;  %v3010_v15 = vld [vmem:[%s3287_s21 + $0x28] sm:$0xff]   ;;  %v3011_v16 = vld [vmem:[%s3287_s21 + $0x78] sm:$0xff]  }
  0x1c   : > { %2778 = vmatpush3.bf16.msra.mxu1 %v905_v8  ;;  %2769 = vmatprep.mubr.msk.bf16.mxu1 %vm531_vm2, %v3005_v10  ;;  %v3012_v17 = vld [vmem:[%s3287_s21 + $0x30] sm:$0xff]   ;;  %v3013_v18 = vld [vmem:[%s3311_s28] sm:$0xff]   ;;  %v3014_v19 = vld [vmem:[%s3287_s21 + $0x38] sm:$0xff]  }
  0x1d   : > { %v3015_v20 = vld [vmem:[%s3311_s28 + $0x8] sm:$0xff]   ;;  %v3016_v21 = vld [vmem:[%s3287_s21 + $0x40] sm:$0xff]   ;;  %v3017_v22 = vld [vmem:[%s3311_s28 + $0x10] sm:$0xff]   ;;  %2951 = vmatprep.subr.msk.bf16.mxu0 %vm1439_vm1, %v1372_v37  ;;  %2879 = vmatprep.subr.bf16.mxu1 %v3032_v41 }
  0x1e   : > { %v3018_v23 = vld [vmem:[%s3287_s21 + $0x48] sm:$0xff]   ;;  %v3019_v24 = vld [vmem:[%s3311_s28 + $0x18] sm:$0xff]   ;;  %v3020_v25 = vld [vmem:[%s3311_s28 + $0x20] sm:$0xff]   ;;  %s2444_s21 = sshll.u32 %s382_s27, 3 }
  0x1f   : > { %v3021_v26 = vld [vmem:[%s3311_s28 + $0x28] sm:$0xff]   ;;  %v3022_v27 = vld [vmem:[%s3311_s28 + $0x30] sm:$0xff]   ;;  %v3023_v28 = vld [vmem:[%s3311_s28 + $0x38] sm:$0xff]   ;;  %s384_s26 = scalar_lea.vmem [#allocation2], %s2444_s21 }
  0x20   : > { %v3024_v29 = vld [vmem:[%s3311_s28 + $0x40] sm:$0xff]   ;;  %v3025_v30 = vld [vmem:[%s3311_s28 + $0x48] sm:$0xff]   ;;  %v3026_v31 = vld [vmem:[%s3311_s28 + $0x50] sm:$0xff]  }
  0x21   : > { %v3027_v32 = vld [vmem:[%s3311_s28 + $0x58] sm:$0xff]   ;;  %v3028_v33 = vld [vmem:[%s3311_s28 + $0x60] sm:$0xff]   ;;  %v3029_v34 = vld [vmem:[%s3311_s28 + $0x68] sm:$0xff]  }
  0x22   : > { %2750 = vmatmul.mubr.msk.bf16.gmra.mrb[4].mxu0 %vm531_vm2, %v3006_v11  ;;  %2770 = vmatmul.mubr.msk.bf16.gmra.mrb[4].mxu1 %vm531_vm2, %v3007_v12  ;;  %v3030_v35 = vld [vmem:[%s3311_s28 + $0x70] sm:$0xff]   ;;  %v3031_v36 = vld [vmem:[%s3311_s28 + $0x78] sm:$0xff]   ;;  %s3762_s28 = scalar_lea.vmem %s4022_s8, %s3281_s12 }
  0x23   : > { %2753 = vmatprep.mubr.msk.bf16.mxu0 %vm531_vm2, %v3008_v13  ;;  %2773 = vmatprep.mubr.msk.bf16.mxu1 %vm531_vm2, %v3009_v14 }
  0x2a   : > { %2754 = vmatmul.mubr.msk.bf16.gmra.mrb[8].mxu0 %vm531_vm2, %v3010_v15  ;;  %2774 = vmatmul.mubr.msk.bf16.gmra.mrb[8].mxu1 %vm531_vm2, %v3011_v16 }
  0x2b   : > { %2757 = vmatprep.mubr.msk.bf16.mxu0 %vm531_vm2, %v3012_v17  ;;  %2779 = vmatprep.mubr.msk.bf16.mxu1 %vm854_vm3, %v3013_v18 }
  0x32   : > { %2758 = vmatmul.mubr.msk.bf16.gmra.mrb[12].mxu0 %vm531_vm2, %v3014_v19  ;;  %2780 = vmatmul.mubr.msk.bf16.vlgmr.msra.gmra.mrb[12].mxu1 %vm854_vm3, %v3015_v20 }
  0x33   : > { %2761 = vmatprep.mubr.msk.bf16.mxu0 %vm531_vm2, %v3016_v21  ;;  %2783 = vmatprep.mubr.msk.bf16.mxu1 %vm854_vm3, %v3017_v22 }
  0x34   : > { %2880 = vmatpush3.bf16.msra.mxu1 %v3032_v41 }
  0x3a   : > { %2762 = vmatmul.mubr.msk.bf16.gmra.mrb[16].mxu0 %vm531_vm2, %v3018_v23  ;;  %2784 = vmatmul.mubr.msk.bf16.gmra.mrb[16].mxu1 %vm854_vm3, %v3019_v24 }
  0x3b   : > { %2787 = vmatprep.mubr.msk.bf16.mxu1 %vm854_vm3, %v3020_v25 }
  0x42   : > { %2788 = vmatmul.mubr.msk.bf16.gmra.mrb[20].mxu1 %vm854_vm3, %v3021_v26 }
  0x43   : > { %2791 = vmatprep.mubr.msk.bf16.mxu1 %vm854_vm3, %v3022_v27 }
  0x4a   : > { %2792 = vmatmul.mubr.msk.bf16.gmra.mrb[24].mxu1 %vm854_vm3, %v3023_v28 }
  0x4b   : > { %2795 = vmatprep.mubr.msk.bf16.mxu1 %vm854_vm3, %v3024_v29 }
  0x52   : > { %2796 = vmatmul.mubr.msk.bf16.gmra.mrb[28].mxu1 %vm854_vm3, %v3025_v30 }
  0x53   : > { %2799 = vmatprep.mubr.msk.bf16.mxu1 %vm854_vm3, %v3026_v31 }
  0x5a   : > { %2800 = vmatmul.mubr.msk.bf16.gmra.mrb[32].mxu1 %vm854_vm3, %v3027_v32 }
  0x5b   : > { %2803 = vmatprep.mubr.msk.bf16.mxu1 %vm854_vm3, %v3028_v33 }
  0x62   : > { %2804 = vmatmul.mubr.msk.bf16.gmra.mrb[36].mxu1 %vm854_vm3, %v3029_v34 }
  0x63   : > { %2807 = vmatprep.mubr.msk.bf16.mxu1 %vm854_vm3, %v3030_v35 }
  0x6a   : > { %2808 = vmatmul.mubr.msk.bf16.gmra.mrb[40].mxu1 %vm854_vm3, %v3031_v36 }
  0xed   : > { %v3365_v38 = vpop.f32.mrb[0].mxu0  ;;  %v3369_v40 = vpop.f32.mrb[0].mxu1 }
  0xee   : > { %v3367_v39 = vpop.f32.mrb[1].mxu0  ;;  %v3376_v43 = vpop.f32.mrb[1].mxu1 }
  0xef   : > { %v3374_v42 = vpop.f32.mrb[2].mxu0  ;;  %v3382_v46 = vpop.f32.mrb[2].mxu1 }
  0xf0   : > { %v1374_v44 = vpack.c.bf16 %v3374_v42, %v3365_v38  ;;  %v3380_v45 = vpop.f32.mrb[3].mxu0  ;;  %v1384_v48 = vpack.c.bf16 %v3382_v46, %v3369_v40  ;;  %v3388_v49 = vpop.f32.mrb[3].mxu1 }
  0xf1   : > { %v1373_v47 = vpack.c.bf16 %v3380_v45, %v3367_v39  ;;  %v1383_v51 = vpack.c.bf16 %v3388_v49, %v3376_v43 }
  0xf3   : > { %2813 = vmatprep.mubr.msk.bf16.mxu0 %vm1390_vm4, %v1373_v47 }
  0xf4   : > { %2814 = vmatmul.mubr.msk.bf16.vlgmr.msra.gmra.mrb[20].mxu0 %vm1390_vm4, %v1374_v44 }
  0xf5   : > { %v3395_v52 = vpop.f32.mrb[4].mxu0  ;;  %2846 = vmatpush3.bf16.msra.mxu0 %v1653_v50  ;;  %v3399_v54 = vpop.f32.mrb[4].mxu1 }
  0xf6   : > { %v3397_v53 = vpop.f32.mrb[5].mxu0  ;;  %v3403_v56 = vpop.f32.mrb[5].mxu1 }
  0xf7   : > { %v3401_v55 = vpop.f32.mrb[6].mxu0  ;;  %v3409_v59 = vpop.f32.mrb[6].mxu1 }
  0xf8   : > { %v1376_v57 = vpack.c.bf16 %v3401_v55, %v3395_v52  ;;  %v3407_v58 = vpop.f32.mrb[7].mxu0  ;;  %v3415_v62 = vpop.f32.mrb[7].mxu1 }
  0xf9   : > { %v1375_v60 = vpack.c.bf16 %v3407_v58, %v3397_v53  ;;  %v1385_v63 = vpack.c.bf16 %v3415_v62, %v3403_v56 }
  0xfb   : > { %2817 = vmatprep.mubr.msk.bf16.mxu0 %vm1390_vm4, %v1375_v60 }
  0xfc   : > { %2818 = vmatmul.mubr.msk.bf16.gmra.mrb[24].mxu0 %vm1390_vm4, %v1376_v57 }
  0xfd   : > { %v3421_v0 = vpop.f32.mrb[8].mxu0  ;;  %v3425_v2 = vpop.f32.mrb[8].mxu1 }
  0xfe   : > { %v3423_v1 = vpop.f32.mrb[9].mxu0  ;;  %v3429_v4 = vpop.f32.mrb[9].mxu1 }
  0xff   : > { %v3427_v3 = vpop.f32.mrb[10].mxu0  ;;  %v3435_v7 = vpop.f32.mrb[10].mxu1 }
 0x100   : > { %v1378_v5 = vpack.c.bf16 %v3427_v3, %v3421_v0  ;;  %v3433_v6 = vpop.f32.mrb[11].mxu0  ;;  %v3441_v10 = vpop.f32.mrb[11].mxu1 }
 0x101   : > { %v1377_v8 = vpack.c.bf16 %v3433_v6, %v3423_v1 }
 0x103   : > { %2821 = vmatprep.mubr.msk.bf16.mxu0 %vm1390_vm4, %v1377_v8 }
 0x104   : > { %2822 = vmatmul.mubr.msk.bf16.gmra.mrb[28].mxu0 %vm1390_vm4, %v1378_v5 }
 0x105   : > { %v3447_v12 = vpop.f32.mrb[12].mxu0  ;;  %v3449_v13 = vpop.f32.mrb[12].mxu1 }
 0x106   : > { %v3451_v14 = vpop.f32.mrb[13].mxu0  ;;  %v1070_v15 = vadd.f32 %v3449_v13, %v3365_v38  ;;  %v3455_v16 = vpop.f32.mrb[13].mxu1 }
 0x107   : > { %v3457_v17 = vpop.f32.mrb[14].mxu0  ;;  %v1068_v18 = vadd.f32 %v3455_v16, %v3367_v39  ;;  %v3463_v20 = vpop.f32.mrb[14].mxu1 }
 0x108   : > { %v1380_v19 = vpack.c.bf16 %v3457_v17, %v3447_v12  ;;  %v3465_v21 = vpop.f32.mrb[15].mxu0  ;;  %v1102_v22 = vmul.f32 0.5, %v1070_v15  ;;  %v1071_v23 = vadd.f32 %v3463_v20, %v3374_v42  ;;  %v3471_v25 = vpop.f32.mrb[15].mxu1 }
 0x109   : > { %v1379_v24 = vpack.c.bf16 %v3465_v21, %v3451_v14  ;;  %v1100_v26 = vmul.f32 0.5, %v1068_v18  ;;  %v1069_v27 = vadd.f32 %v3471_v25, %v3380_v45 }
 0x10a   : > { %3034 = vtanh.f32 %v1102_v22  ;;  %v1103_v28 = vmul.f32 0.5, %v1071_v23 }
 0x10b   : > { %2825 = vmatprep.mubr.msk.bf16.mxu0 %vm1390_vm4, %v1379_v24  ;;  %3036 = vtanh.f32 %v1100_v26  ;;  %v1101_v29 = vmul.f32 0.5, %v1069_v27 }
 0x10c   : > { %2826 = vmatmul.mubr.msk.bf16.gmra.mrb[32].mxu0 %vm1390_vm4, %v1380_v19  ;;  %3038 = vtanh.f32 %v1103_v28 }
 0x10d   : > { %v3477_v30 = vpop.f32.mrb[16].mxu0  ;;  %3040 = vtanh.f32 %v1101_v29  ;;  %v3479_v31 = vpop.f32.mrb[16].mxu1 }
 0x10e   : > { %v3481_v32 = vpop.f32.mrb[17].mxu0  ;;  %v1074_v33 = vadd.f32 %v3479_v31, %v3395_v52  ;;  %v3485_v34 = vpop.f32.mrb[17].mxu1 }
 0x10f   : > { %v3487_v35 = vpop.f32.mrb[18].mxu0  ;;  %v1072_v36 = vadd.f32 %v3485_v34, %v3397_v53  ;;  %v3493_v41 = vpop.f32.mrb[18].mxu1 }
 0x110   : > { %v1382_v37 = vpack.c.bf16 %v3487_v35, %v3477_v30  ;;  %v3495_v44 = vpop.f32.mrb[19].mxu0  ;;  %v1106_v47 = vmul.f32 0.5, %v1074_v33  ;;  %v1075_v50 = vadd.f32 %v3493_v41, %v3401_v55  ;;  %v3501_v60 = vpop.f32.mrb[19].mxu1 }
 0x111   : > { %v1381_v57 = vpack.c.bf16 %v3495_v44, %v3481_v32  ;;  %v1104_v5 = vmul.f32 0.5, %v1072_v36  ;;  %v1073_v8 = vadd.f32 %v3501_v60, %v3407_v58 }
 0x112   : > { %3042 = vtanh.f32 %v1106_v47  ;;  %v1107_v15 = vmul.f32 0.5, %v1075_v50 }
 0x113   : > { %2829 = vmatprep.mubr.msk.bf16.mxu0 %vm1390_vm4, %v1381_v57  ;;  %3044 = vtanh.f32 %v1104_v5  ;;  %v1105_v18 = vmul.f32 0.5, %v1073_v8 }
 0x114   : > { %2830 = vmatmul.mubr.msk.bf16.gmra.mrb[36].mxu0 %vm1390_vm4, %v1382_v37  ;;  %v3035_v19 = vpop.eup %3034  ;;  %3046 = vtanh.f32 %v1107_v15 }
 0x115   : > { %2833 = vmatprep.mubr.msk.bf16.mxu0 %vm1390_vm4, %v1383_v51  ;;  %v3037_v22 = vpop.eup %3036  ;;  %v1166_v23 = vadd.f32 1.0, %v3035_v19  ;;  %3048 = vtanh.f32 %v1105_v18  ;;  %v3511_v24 = vpop.f32.mrb[20].mxu1 }
 0x116   : > { %v3039_v26 = vpop.eup %3038  ;;  %v1164_v27 = vadd.f32 1.0, %v3037_v22  ;;  %v1078_v28 = vadd.f32 %v3511_v24, %v3421_v0  ;;  %v3515_v29 = vpop.f32.mrb[21].mxu1 }
 0x117   : > { %v3041_v33 = vpop.eup %3040  ;;  %v1198_v36 = vmul.f32 0.5, %v1166_v23  ;;  %v1167_v37 = vadd.f32 1.0, %v3039_v26  ;;  %v1076_v47 = vadd.f32 %v3515_v29, %v3423_v1  ;;  %v3519_v50 = vpop.f32.mrb[22].mxu1 }
 0x118   : > { %v1196_v51 = vmul.f32 0.5, %v1164_v27  ;;  %v1165_v57 = vadd.f32 1.0, %v3041_v33  ;;  %v1110_v5 = vmul.f32 0.5, %v1078_v28  ;;  %v1079_v8 = vadd.f32 %v3519_v50, %v3427_v3  ;;  %v3523_v15 = vpop.f32.mrb[23].mxu1 }
 0x119   : > { %v1230_v18 = vmul.f32 %v3365_v38, %v1198_v36  ;;  %v1262_v19 = vsub.f32 1.0, %v1198_v36  ;;  %v1199_v22 = vmul.f32 0.5, %v1167_v37  ;;  %v1108_v9 = vmul.f32 0.5, %v1076_v47 }
 0x11a   : > { %v1228_v23 = vmul.f32 %v1196_v51, %v3367_v39  ;;  %v1260_v26 = vsub.f32 1.0, %v1196_v51  ;;  %v1197_v11 = vmul.f32 0.5, %v1165_v57  ;;  %3050 = vtanh.f32 %v1110_v5 }
 0x11b   : > { %v1294_v61 = vmul.f32 %v3449_v13, %v1262_v19  ;;  %v1231_v27 = vmul.f32 %v3374_v42, %v1199_v22  ;;  %v1263_v28 = vsub.f32 1.0, %v1199_v22  ;;  %3052 = vtanh.f32 %v1108_v9 }
 0x11c   : > { %2834 = vmatmul.mubr.msk.bf16.gmra.mrb[40].mxu0 %vm1390_vm4, %v1384_v48  ;;  %v3043_v38 = vpop.eup %3042  ;;  %v1292_v33 = vmul.f32 %v1260_v26, %v3455_v16  ;;  %v1229_v36 = vmul.f32 %v1197_v11, %v3380_v45  ;;  %v1261_v39 = vsub.f32 1.0, %v1197_v11  ;;  %v1111_v37 = vmul.f32 0.5, %v1079_v8 }
 0x11d   : > { %2837 = vmatprep.mubr.msk.bf16.mxu0 %vm1390_vm4, %v1385_v63  ;;  %v3045_v42 = vpop.eup %3044  ;;  %v3539_v13 = vadd.f32 %v1294_v61, %v1230_v18  ;;  %v1295_v9 = vmul.f32 %v3463_v20, %v1263_v28  ;;  %v1170_v47 = vadd.f32 1.0, %v3043_v38  ;;  %v1077_v48 = vadd.f32 %v3523_v15, %v3433_v6  ;;  %v3544_v51 = vpop.f32.mrb[24].mxu1 }
 0x11e   : > { %v3047_v16 = vpop.eup %3046  ;;  %v3546_v45 = vadd.f32 %v1292_v33, %v1228_v23  ;;  %v1293_v11 = vmul.f32 %v1261_v39, %v3471_v25  ;;  %v1168_v57 = vadd.f32 1.0, %v3045_v42  ;;  %3054 = vtanh.f32 %v1111_v37  ;;  %v3549_v5 = vpop.f32.mrb[25].mxu1 }
 0x11f   : > { %v3049_v63 = vpop.eup %3048  ;;  %v3551_v61 = vadd.f32 %v1295_v9, %v1231_v27  ;;  %v1202_v8 = vmul.f32 0.5, %v1170_v47  ;;  %v1171_v20 = vadd.f32 1.0, %v3047_v16  ;;  %v1109_v18 = vmul.f32 0.5, %v1077_v48  ;;  %v3553_v19 = vpop.f32.mrb[26].mxu1 }
 0x120   : > { %v3555_v22 = vadd.f32 %v1293_v11, %v1229_v36  ;;  %v1200_v26 = vmul.f32 0.5, %v1168_v57  ;;  %v1169_v28 = vadd.f32 1.0, %v3049_v63  ;;  %v1082_v23 = vadd.f32 %v3544_v51, %v3447_v12  ;;  %v3559_v25 = vpop.f32.mrb[27].mxu1 }
 0x121   : > { %v1357_v38 = vpack.c.bf16 %v3551_v61, %v3539_v13  ;;  %v1234_v27 = vmul.f32 %v3395_v52, %v1202_v8  ;;  %v1266_v33 = vsub.f32 1.0, %v1202_v8  ;;  %v1203_v39 = vmul.f32 0.5, %v1171_v20 }
 0x122   : > { %v1356_v37 = vpack.c.bf16 %v3555_v22, %v3546_v45  ;;  %v1232_v36 = vmul.f32 %v1200_v26, %v3397_v53  ;;  %v1264_v42 = vsub.f32 1.0, %v1200_v26  ;;  %v1201_v9 = vmul.f32 0.5, %v1169_v28 }
 0x123   : > { %v1298_v47 = vmul.f32 %v3479_v31, %v1266_v33  ;;  %v1235_v48 = vmul.f32 %v3401_v55, %v1203_v39  ;;  %v1267_v16 = vsub.f32 1.0, %v1203_v39  ;;  %3056 = vtanh.f32 %v1109_v18 }
 0x124   : > { %v4027_v11 = vpack.c.bf16 %v3409_v59, %v3399_v54  ;;  %v3051_v52 = vpop.eup %3050  ;;  %v1296_v57 = vmul.f32 %v1264_v42, %v3485_v34  ;;  %v1233_v45 = vmul.f32 %v1201_v9, %v3407_v58  ;;  %v1265_v63 = vsub.f32 1.0, %v1201_v9 }
 0x125   : > { %v1114_v53 = vmul.f32 0.5, %v1082_v23  ;;  %v4028_v8 = vpack.c.bf16 %v3441_v10, %v3429_v4  ;;  %v3053_v55 = vpop.eup %3052  ;;  %v3579_v31 = vadd.f32 %v1298_v47, %v1234_v27  ;;  %v1299_v20 = vmul.f32 %v3493_v41, %v1267_v16  ;;  %v3584_v26 = vpop.f32.mrb[28].mxu1 }
 0x126   : > { %2838 = vmatmul.mubr.msk.bf16.gmra.mrb[44].mxu0 %vm1390_vm4, %v4027_v11  ;;  %v1174_v18 = vadd.f32 1.0, %v3051_v52  ;;  %v1080_v22 = vadd.f32 %v3549_v5, %v3451_v14  ;;  %v3586_v34 = vadd.f32 %v1296_v57, %v1232_v36  ;;  %v1297_v58 = vmul.f32 %v1265_v63, %v3501_v60  ;;  %v3589_v23 = vpop.f32.mrb[29].mxu1 }
 0x127   : > { %2841 = vmatprep.mubr.msk.bf16.mxu0 %vm1390_vm4, %v4028_v8  ;;  %v1172_v28 = vadd.f32 1.0, %v3053_v55  ;;  %3058 = vtanh.f32 %v1114_v53  ;;  %v3591_v33 = vadd.f32 %v1299_v20, %v1235_v48  ;;  %v1083_v41 = vadd.f32 %v3553_v19, %v3457_v17  ;;  %v3595_v42 = vpop.f32.mrb[30].mxu1 }
 0x128   : > { %v1206_v27 = vmul.f32 0.5, %v1174_v18  ;;  %v1112_v39 = vmul.f32 0.5, %v1080_v22  ;;  %v3055_v9 = vpop.eup %3054  ;;  %v3597_v47 = vadd.f32 %v1297_v58, %v1233_v45  ;;  %v1081_v60 = vadd.f32 %v3559_v25, %v3465_v21  ;;  %v3603_v11 = vpop.f32.mrb[31].mxu1 }
 0x129   : > { %v1204_v36 = vmul.f32 0.5, %v1172_v28  ;;  %v1086_v16 = vadd.f32 %v3584_v26, %v3477_v30  ;;  %v1359_v48 = vpack.c.bf16 %v3591_v33, %v3579_v31  ;;  %v1175_v63 = vadd.f32 1.0, %v3055_v9 }
 0x12a   : > { %v1238_v52 = vmul.f32 %v3421_v0, %v1206_v27  ;;  %v1270_v57 = vsub.f32 1.0, %v1206_v27  ;;  %v1358_v45 = vpack.c.bf16 %v3597_v47, %v3586_v34  ;;  %3060 = vtanh.f32 %v1112_v39 }
 0x12b   : > { %v1236_v53 = vmul.f32 %v1204_v36, %v3423_v1  ;;  %v1268_v8 = vsub.f32 1.0, %v1204_v36  ;;  %v1207_v20 = vmul.f32 0.5, %v1175_v63  ;;  %v1115_v18 = vmul.f32 0.5, %v1083_v41 }
 0x12c   : > { %v1302_v55 = vmul.f32 %v3511_v24, %v1270_v57  ;;  %v1113_v22 = vmul.f32 0.5, %v1081_v60  ;;  %v4029_v58 = vpack.c.bf16 %v3435_v7, %v3425_v2  ;;  %v1118_v28 = vmul.f32 0.5, %v1086_v16 }
 0x12d   : > { %v1300_v0 = vmul.f32 %v1268_v8, %v3515_v29  ;;  %v1084_v34 = vadd.f32 %v3589_v23, %v3481_v32  ;;  %v1087_v1 = vadd.f32 %v3595_v42, %v3487_v35  ;;  %v3057_v24 = vpop.eup %3056  ;;  %v1239_v39 = vmul.f32 %v3427_v3, %v1207_v20  ;;  %v3625_v9 = vpop.f32.mrb[32].mxu1 }
 0x12e   : > { %2842 = vmatmul.mubr.msk.bf16.gmra.mrb[48].mxu0 %vm1390_vm4, %v4029_v58  ;;  %v3622_v27 = vadd.f32 %v1302_v55, %v1238_v52  ;;  %v1271_v41 = vsub.f32 1.0, %v1207_v20  ;;  %3062 = vtanh.f32 %v1115_v18  ;;  %v1173_v29 = vadd.f32 1.0, %v3057_v24  ;;  %v3629_v60 = vpop.f32.mrb[33].mxu1 }
 0x12f   : > { %2847 = vmatprep.mubr.msk.bf16.mxu0 %vm1390_vm4, %v1356_v37  ;;  %v3627_v47 = vadd.f32 %v1300_v0, %v1236_v53  ;;  %3064 = vtanh.f32 %v1113_v22  ;;  %v1116_v36 = vmul.f32 0.5, %v1084_v34  ;;  %v1119_v37 = vmul.f32 0.5, %v1087_v1  ;;  %v3634_v57 = vpop.f32.mrb[34].mxu1 }
 0x130   : > { %v1303_v16 = vmul.f32 %v3519_v50, %v1271_v41  ;;  %3066 = vtanh.f32 %v1118_v28  ;;  %v1085_v52 = vadd.f32 %v3603_v11, %v3495_v44  ;;  %v1205_v63 = vmul.f32 0.5, %v1173_v29  ;;  %v3640_v55 = vpop.f32.mrb[35].mxu1 }
 0x131   : > { %v3059_v3 = vpop.eup %3058  ;;  %3068 = vtanh.f32 %v1116_v36  ;;  %v1090_v53 = vadd.f32 %v3625_v9, %v3369_v40  ;;  %v1088_v8 = vadd.f32 %v3629_v60, %v3376_v43  ;;  %v1091_v24 = vadd.f32 %v3634_v57, %v3382_v46 }
 0x132   : > { %v3642_v20 = vadd.f32 %v1303_v16, %v1239_v39  ;;  %v1178_v50 = vadd.f32 1.0, %v3059_v3  ;;  %3070 = vtanh.f32 %v1119_v37  ;;  %v1117_v18 = vmul.f32 0.5, %v1085_v52 }
 0x133   : > { %v1237_v22 = vmul.f32 %v1205_v63, %v3433_v6  ;;  %v1269_v58 = vsub.f32 1.0, %v1205_v63  ;;  %v1122_v0 = vmul.f32 0.5, %v1090_v53  ;;  %v1120_v28 = vmul.f32 0.5, %v1088_v8 }
 0x134   : > { %v1361_v34 = vpack.c.bf16 %v3642_v20, %v3622_v27  ;;  %v1210_v1 = vmul.f32 0.5, %v1178_v50  ;;  %3072 = vtanh.f32 %v1117_v18  ;;  %v3061_v39 = vpop.eup %3060  ;;  %v1089_v6 = vadd.f32 %v3640_v55, %v3388_v49 }
 0x135   : > { %v1301_v41 = vmul.f32 %v1269_v58, %v3523_v15  ;;  %3074 = vtanh.f32 %v1122_v0  ;;  %v1176_v16 = vadd.f32 1.0, %v3061_v39  ;;  %v3658_v37 = vpop.f32.mrb[36].mxu1  ;;  %v1123_v13 = vmul.f32 0.5, %v1091_v24 }
 0x136   : > { %2848 = vmatmul.mubr.msk.bf16.vlgmr.msra.gmra.mrb[20].mxu0 %vm1390_vm4, %v1357_v38  ;;  %v1242_v29 = vmul.f32 %v3447_v12, %v1210_v1  ;;  %v1274_v36 = vsub.f32 1.0, %v1210_v1  ;;  %3076 = vtanh.f32 %v1120_v28  ;;  %v1121_v61 = vmul.f32 0.5, %v1089_v6  ;;  %v3662_v15 = vpop.f32.mrb[37].mxu1 }
 0x137   : > { %2851 = vmatprep.mubr.msk.bf16.mxu0 %vm1390_vm4, %v1358_v45  ;;  %v1333_v52 = vadd.f32 %v1301_v41, %v1237_v22  ;;  %v1094_v38 = vadd.f32 %v3658_v37, %v3399_v54  ;;  %v1208_v53 = vmul.f32 0.5, %v1176_v16  ;;  %v1092_v12 = vadd.f32 %v3662_v15, %v3403_v56  ;;  %v3667_v45 = vpop.f32.mrb[38].mxu1 }
 0x138   : > { %v3063_v3 = vpop.eup %3062  ;;  %v1306_v63 = vmul.f32 %v3544_v51, %v1274_v36  ;;  %3078 = vtanh.f32 %v1123_v13  ;;  %v3670_v58 = vpop.f32.mrb[39].mxu1 }
 0x139   : > { %v3065_v8 = vpop.eup %3064  ;;  %v1360_v50 = vpack.c.bf16 %v1333_v52, %v3627_v47  ;;  %v1179_v18 = vadd.f32 1.0, %v3063_v3  ;;  %v1126_v22 = vmul.f32 0.5, %v1094_v38  ;;  %v1240_v1 = vmul.f32 %v1208_v53, %v3451_v14 }
 0x13a   : > { %v3067_v0 = vpop.eup %3066  ;;  %v3672_v28 = vadd.f32 %v1306_v63, %v1242_v29  ;;  %v1272_v51 = vsub.f32 1.0, %v1208_v53  ;;  %v1177_v24 = vadd.f32 1.0, %v3065_v8  ;;  %3080 = vtanh.f32 %v1121_v61 }
 0x13b   : > { %v3069_v39 = vpop.eup %3068  ;;  %v1211_v41 = vmul.f32 0.5, %v1179_v18  ;;  %v1182_v6 = vadd.f32 1.0, %v3067_v0  ;;  %v1124_v36 = vmul.f32 0.5, %v1092_v12  ;;  %3082 = vtanh.f32 %v1126_v22 }
 0x13c   : > { %v3071_v16 = vpop.eup %3070  ;;  %v1304_v47 = vmul.f32 %v1272_v51, %v3549_v5  ;;  %v1209_v52 = vmul.f32 0.5, %v1177_v24  ;;  %v1180_v13 = vadd.f32 1.0, %v3069_v39 }
 0x13d   : > { %v1243_v14 = vmul.f32 %v3457_v17, %v1211_v41  ;;  %v1275_v29 = vsub.f32 1.0, %v1211_v41  ;;  %v1214_v38 = vmul.f32 0.5, %v1182_v6  ;;  %v1183_v3 = vadd.f32 1.0, %v3071_v16  ;;  %v3683_v8 = vpop.f32.mrb[40].mxu1 }
 0x13e   : > { %2852 = vmatmul.mubr.msk.bf16.gmra.mrb[24].mxu0 %vm1390_vm4, %v1359_v48  ;;  %v3073_v61 = vpop.eup %3072  ;;  %v1336_v63 = vadd.f32 %v1304_v47, %v1240_v1  ;;  %v1241_v53 = vmul.f32 %v1209_v52, %v3465_v21  ;;  %v1273_v5 = vsub.f32 1.0, %v1209_v52  ;;  %v1212_v12 = vmul.f32 0.5, %v1180_v13  ;;  %v3687_v22 = vpop.f32.mrb[41].mxu1 }
 0x13f   : > { %2855 = vmatprep.mubr.msk.bf16.mxu0 %vm1390_vm4, %v1360_v50  ;;  %v3075_v18 = vpop.eup %3074  ;;  %v1307_v31 = vmul.f32 %v3553_v19, %v1275_v29  ;;  %v1246_v33 = vmul.f32 %v3477_v30, %v1214_v38  ;;  %v1278_v48 = vsub.f32 1.0, %v1214_v38  ;;  %v1215_v17 = vmul.f32 0.5, %v1183_v3  ;;  %v3691_v24 = vpop.f32.mrb[42].mxu1 }
 0x140   : > { %v3077_v0 = vpop.eup %3076  ;;  %v1305_v50 = vmul.f32 %v1273_v5, %v3559_v25  ;;  %v1244_v1 = vmul.f32 %v1212_v12, %v3481_v32  ;;  %v1276_v51 = vsub.f32 1.0, %v1212_v12  ;;  %v1181_v21 = vadd.f32 1.0, %v3073_v61  ;;  %v3695_v30 = vpop.f32.mrb[43].mxu1 }
 0x141   : > { %v1339_v39 = vadd.f32 %v1307_v31, %v1243_v14  ;;  %v1310_v41 = vmul.f32 %v3584_v26, %v1278_v48  ;;  %v1247_v19 = vmul.f32 %v3487_v35, %v1215_v17  ;;  %v1279_v6 = vsub.f32 1.0, %v1215_v17 }
 0x142   : > { %v1337_v16 = vadd.f32 %v1305_v50, %v1241_v53  ;;  %v1308_v47 = vmul.f32 %v1276_v51, %v3589_v23  ;;  %v1213_v52 = vmul.f32 0.5, %v1181_v21  ;;  %v1186_v13 = vadd.f32 1.0, %v3075_v18  ;;  %v3079_v25 = vpop.eup %3078 }
 0x143   : > { %v1363_v32 = vpack.c.bf16 %v1339_v39, %v3672_v28  ;;  %v3699_v29 = vadd.f32 %v1310_v41, %v1246_v33  ;;  %v1311_v38 = vmul.f32 %v3595_v42, %v1279_v6  ;;  %v1184_v14 = vadd.f32 1.0, %v3077_v0 }
 0x144   : > { %v1362_v3 = vpack.c.bf16 %v1337_v16, %v1336_v63  ;;  %v1340_v26 = vadd.f32 %v1308_v47, %v1244_v1  ;;  %v1245_v35 = vmul.f32 %v1213_v52, %v3495_v44  ;;  %v1277_v61 = vsub.f32 1.0, %v1213_v52  ;;  %v3081_v23 = vpop.eup %3080 }
 0x145   : > { %v1343_v53 = vadd.f32 %v1311_v38, %v1247_v19  ;;  %v1218_v5 = vmul.f32 0.5, %v1186_v13  ;;  %v1216_v12 = vmul.f32 0.5, %v1184_v14  ;;  %v1187_v28 = vadd.f32 1.0, %v3079_v25  ;;  %v3083_v18 = vpop.eup %3082 }
 0x146   : > { %2856 = vmatmul.mubr.msk.bf16.gmra.mrb[28].mxu0 %vm1390_vm4, %v1361_v34  ;;  %v1309_v31 = vmul.f32 %v1277_v61, %v3603_v11  ;;  %v1185_v42 = vadd.f32 1.0, %v3081_v23  ;;  %3084 = vtanh.f32 %v1124_v36  ;;  %v1095_v63 = vadd.f32 %v3667_v45, %v3409_v59 }
 0x147   : > { %2859 = vmatprep.mubr.msk.bf16.mxu0 %vm1390_vm4, %v1362_v3  ;;  %v1365_v44 = vpack.c.bf16 %v1343_v53, %v3699_v29  ;;  %v1250_v27 = vmul.f32 %v3369_v40, %v1218_v5  ;;  %v1282_v20 = vsub.f32 1.0, %v1218_v5  ;;  %v1248_v34 = vmul.f32 %v1216_v12, %v3376_v43 }
 0x148   : > { %v1341_v33 = vadd.f32 %v1309_v31, %v1245_v35  ;;  %v1280_v48 = vsub.f32 1.0, %v1216_v12  ;;  %v1219_v17 = vmul.f32 0.5, %v1187_v28  ;;  %v1217_v0 = vmul.f32 0.5, %v1185_v42 }
 0x149   : > { %v1314_v11 = vmul.f32 %v3625_v9, %v1282_v20  ;;  %v1190_v50 = vadd.f32 1.0, %v3083_v18  ;;  %v1127_v36 = vmul.f32 0.5, %v1095_v63  ;;  %v1093_v1 = vadd.f32 %v3670_v58, %v3415_v62 }
 0x14a   : > { %v1364_v51 = vpack.c.bf16 %v1341_v33, %v1340_v26  ;;  %v1312_v21 = vmul.f32 %v1280_v48, %v3629_v60  ;;  %v1251_v39 = vmul.f32 %v3382_v46, %v1219_v17  ;;  %v1283_v40 = vsub.f32 1.0, %v1219_v17 }
 0x14b   : > { %v1346_v41 = vadd.f32 %v1314_v11, %v1250_v27  ;;  %v1249_v43 = vmul.f32 %v1217_v0, %v3388_v49  ;;  %v1281_v19 = vsub.f32 1.0, %v1217_v0  ;;  %v1222_v6 = vmul.f32 0.5, %v1190_v50 }
 0x14c   : > { %v1344_v16 = vadd.f32 %v1312_v21, %v1248_v34  ;;  %v1315_v47 = vmul.f32 %v3634_v57, %v1283_v40  ;;  %3086 = vtanh.f32 %v1127_v36  ;;  %v1125_v9 = vmul.f32 0.5, %v1093_v1 }
 0x14d   : > { %v1313_v52 = vmul.f32 %v1281_v19, %v3640_v55  ;;  %v1254_v13 = vmul.f32 %v3399_v54, %v1222_v6  ;;  %v1286_v60 = vsub.f32 1.0, %v1222_v6  ;;  %v1098_v46 = vadd.f32 %v3683_v8, %v3425_v2 }
 0x14e   : > { %2860 = vmatmul.mubr.msk.bf16.gmra.mrb[32].mxu0 %vm1390_vm4, %v1363_v32  ;;  %v1347_v49 = vadd.f32 %v1315_v47, %v1251_v39  ;;  %3088 = vtanh.f32 %v1125_v9  ;;  %v1096_v25 = vadd.f32 %v3687_v22, %v3429_v4  ;;  %v1099_v57 = vadd.f32 %v3691_v24, %v3435_v7 }
 0x14f   : > { %2863 = vmatprep.mubr.msk.bf16.mxu0 %vm1390_vm4, %v1364_v51  ;;  %v1345_v29 = vadd.f32 %v1313_v52, %v1249_v43  ;;  %v1318_v32 = vmul.f32 %v3658_v37, %v1286_v60  ;;  %v1130_v55 = vmul.f32 0.5, %v1098_v46  ;;  %v1097_v54 = vadd.f32 %v3695_v30, %v3441_v10 }
 0x150   : > { %v3085_v38 = vpop.eup %3084  ;;  %v1367_v14 = vpack.c.bf16 %v1347_v49, %v1346_v41  ;;  %v1128_v3 = vmul.f32 0.5, %v1096_v25  ;;  %v1131_v26 = vmul.f32 0.5, %v1099_v57 }
 0x151   : > { %v1366_v35 = vpack.c.bf16 %v1345_v29, %v1344_v16  ;;  %v1350_v61 = vadd.f32 %v1318_v32, %v1254_v13  ;;  %v1188_v23 = vadd.f32 1.0, %v3085_v38  ;;  %3090 = vtanh.f32 %v1130_v55 }
 0x152   : > { %3092 = vtanh.f32 %v1128_v3  ;;  %v1129_v53 = vmul.f32 0.5, %v1097_v54 }
 0x153   : > { %v1220_v5 = vmul.f32 0.5, %v1188_v23  ;;  %3094 = vtanh.f32 %v1131_v26 }
 0x154   : > { %3096 = vtanh.f32 %v1129_v53 }
 0x155   : > { %v1252_v37 = vmul.f32 %v1220_v5, %v3403_v56  ;;  %v1284_v12 = vsub.f32 1.0, %v1220_v5 }
 0x156   : > { %2864 = vmatmul.mubr.msk.bf16.gmra.mrb[36].mxu0 %vm1390_vm4, %v1365_v44  ;;  %v3087_v28 = vpop.eup %3086 }
 0x157   : > { %2867 = vmatprep.mubr.msk.bf16.mxu0 %vm1390_vm4, %v1366_v35  ;;  %v1316_v18 = vmul.f32 %v1284_v12, %v3662_v15  ;;  %v1191_v31 = vadd.f32 1.0, %v3087_v28 }
 0x158   : > { %v3089_v42 = vpop.eup %3088 }
 0x159   : > { %v1348_v63 = vadd.f32 %v1316_v18, %v1252_v37  ;;  %v1223_v27 = vmul.f32 0.5, %v1191_v31  ;;  %v1189_v20 = vadd.f32 1.0, %v3089_v42 }
 0x15b   : > { %v3091_v34 = vpop.eup %3090  ;;  %v1255_v33 = vmul.f32 %v3409_v59, %v1223_v27  ;;  %v1287_v48 = vsub.f32 1.0, %v1223_v27  ;;  %v1221_v17 = vmul.f32 0.5, %v1189_v20 }
 0x15c   : > { %v3093_v0 = vpop.eup %3092  ;;  %v1194_v44 = vadd.f32 1.0, %v3091_v34 }
 0x15d   : > { %v3095_v56 = vpop.eup %3094  ;;  %v1319_v11 = vmul.f32 %v3667_v45, %v1287_v48  ;;  %v1253_v50 = vmul.f32 %v1221_v17, %v3415_v62  ;;  %v1285_v15 = vsub.f32 1.0, %v1221_v17  ;;  %v1192_v36 = vadd.f32 1.0, %v3093_v0 }
 0x15e   : > { %2868 = vmatmul.mubr.msk.bf16.gmra.mrb[40].mxu0 %vm1390_vm4, %v1367_v14  ;;  %v3097_v1 = vpop.eup %3096  ;;  %v1226_v51 = vmul.f32 0.5, %v1194_v44  ;;  %v1195_v21 = vadd.f32 1.0, %v3095_v56 }
 0x15f   : > { %v1351_v39 = vadd.f32 %v1319_v11, %v1255_v33  ;;  %v1317_v40 = vmul.f32 %v1285_v15, %v3670_v58  ;;  %v1224_v59 = vmul.f32 0.5, %v1192_v36  ;;  %v1193_v41 = vadd.f32 1.0, %v3097_v1 }
 0x160   : > { %v1258_v43 = vmul.f32 %v3425_v2, %v1226_v51  ;;  %v1290_v19 = vsub.f32 1.0, %v1226_v51  ;;  %v1227_v6 = vmul.f32 0.5, %v1195_v21 }
 0x161   : > { %v1369_v16 = vpack.c.bf16 %v1351_v39, %v1350_v61  ;;  %v1349_v47 = vadd.f32 %v1317_v40, %v1253_v50  ;;  %v1256_v45 = vmul.f32 %v1224_v59, %v3429_v4  ;;  %v1288_v9 = vsub.f32 1.0, %v1224_v59 }
 0x162   : > { %v1322_v62 = vmul.f32 %v3683_v8, %v1290_v19  ;;  %v1259_v52 = vmul.f32 %v3435_v7, %v1227_v6  ;;  %v1291_v13 = vsub.f32 1.0, %v1227_v6  ;;  %v1225_v60 = vmul.f32 0.5, %v1193_v41 }
 0x163   : > { %v1368_v46 = vpack.c.bf16 %v1349_v47, %v1348_v63  ;;  %v1320_v58 = vmul.f32 %v1288_v9, %v3687_v22 }
 0x164   : > { %v1354_v49 = vadd.f32 %v1322_v62, %v1258_v43  ;;  %v1323_v25 = vmul.f32 %v3691_v24, %v1291_v13  ;;  %v1257_v2 = vmul.f32 %v1225_v60, %v3441_v10  ;;  %v1289_v57 = vsub.f32 1.0, %v1225_v60  ;;  %v3033_v10 = vld [vmem:[%s4020_s6 + $0x8] sm:$0xff]  }
 0x165   : > { %v1352_v29 = vadd.f32 %v1320_v58, %v1256_v45  ;;  %2871 = vmatprep.mubr.msk.bf16.mxu0 %vm1390_vm4, %v1368_v46  ;;  %2881 = vmatprep.subr.bf16.mxu1 %v3033_v10 }
 0x166   : > { %v1355_v4 = vadd.f32 %v1323_v25, %v1259_v52  ;;  %v1321_v8 = vmul.f32 %v1289_v57, %v3695_v30  ;;  %2872 = vmatmul.mubr.msk.bf16.gmra.mrb[44].mxu0 %vm1390_vm4, %v1369_v16  ;;  %2882 = vmatpush3.bf16.msra.mxu1 %v3033_v10 }
 0x168   : > { %v1371_v7 = vpack.c.bf16 %v1355_v4, %v1354_v49  ;;  %v1353_v32 = vadd.f32 %v1321_v8, %v1257_v2 }
 0x16a   : > { %v1370_v55 = vpack.c.bf16 %v1353_v32, %v1352_v29 }
 0x16c   : > { %2875 = vmatprep.mubr.msk.bf16.mxu0 %vm1390_vm4, %v1370_v55 }
 0x16e   : > { %2876 = vmatmul.mubr.msk.bf16.gmra.mrb[48].mxu0 %vm1390_vm4, %v1371_v7 }
 0x209   : > { %v2849_v22 = vpop.f32.mrb[20].mxu0 }
 0x20a   : > { %v2608_v24 = vpack.c.bf16 %v2849_v22, %v2849_v22  ;;  %v1689_v30 = vpop.f32.mrb[21].mxu0 }
 0x20b   : > { %v2606_v54 = vpack.c.bf16 %v1689_v30, %v1689_v30  ;;  %v2850_v38 = vpop.f32.mrb[22].mxu0 }
 0x20c   : > { %1947 = vst.msk [vmem:[%s3762_s28 + $0x8] sm:$0xf] %vm1944_vm5, %v2608_v24  ;;  %v3766_v14 = vpack.c.bf16 %v2850_v38, %v2849_v22  ;;  %v2609_v3 = vpack.c.bf16 %v2850_v38, %v2850_v38  ;;  %v1692_v26 = vpop.f32.mrb[23].mxu0 }
 0x20d   : > { %1945 = vst.msk [vmem:[%s3762_s28] sm:$0xf] %vm1944_vm5, %v2606_v54  ;;  %v3770_v35 = vpack.c.bf16 %v1692_v26, %v1689_v30  ;;  %v2607_v61 = vpack.c.bf16 %v1692_v26, %v1692_v26 }
 0x20e   : > { %1948 = vst.msk [vmem:[%s3762_s28 + $0xc] sm:$0xf] %vm1944_vm5, %v2609_v3  ;;  %v1998_v32 = vsel %vm1993_vm6, %v3766_v14, 0 }
 0x20f   : > { %1946 = vst.msk [vmem:[%s3762_s28 + $0x4] sm:$0xf] %vm1944_vm5, %v2607_v61  ;;  %2883 = vmatprep.mubr.msk.bf16.mxu1 %vm1993_vm6, %v3770_v35  ;;  %v1995_v60 = vsel %vm1993_vm6, %v3770_v35, 0 }
 0x210   : > { %2884 = vmatmul.mubr.msk.bf16.vlgmr.msra.gmra.mrb[44].mxu1 %vm1993_vm6, %v3766_v14 }
 0x211   : > { %v2853_v23 = vpop.f32.mrb[24].mxu0 }
 0x212   : > { %v2612_v53 = vpack.c.bf16 %v2853_v23, %v2853_v23  ;;  %v1705_v5 = vpop.f32.mrb[25].mxu0 }
 0x213   : > { %v2610_v37 = vpack.c.bf16 %v1705_v5, %v1705_v5  ;;  %v2854_v12 = vpop.f32.mrb[26].mxu0 }
 0x214   : > { %1951 = vst.msk [vmem:[%s3762_s28 + $0x18] sm:$0xf] %vm1944_vm5, %v2612_v53  ;;  %v3782_v28 = vpack.c.bf16 %v2854_v12, %v2853_v23  ;;  %v2613_v18 = vpack.c.bf16 %v2854_v12, %v2854_v12  ;;  %v1708_v31 = vpop.f32.mrb[27].mxu0 }
 0x215   : > { %1949 = vst.msk [vmem:[%s3762_s28 + $0x10] sm:$0xf] %vm1944_vm5, %v2610_v37  ;;  %v3786_v42 = vpack.c.bf16 %v1708_v31, %v1705_v5  ;;  %v2611_v63 = vpack.c.bf16 %v1708_v31, %v1708_v31 }
 0x216   : > { %1952 = vst.msk [vmem:[%s3762_s28 + $0x1c] sm:$0xf] %vm1944_vm5, %v2613_v18 }
 0x217   : > { %1950 = vst.msk [vmem:[%s3762_s28 + $0x14] sm:$0xf] %vm1944_vm5, %v2611_v63  ;;  %2887 = vmatprep.mubr.msk.bf16.mxu1 %vm1993_vm6, %v3786_v42  ;;  %v2001_v14 = vsel %vm1993_vm6, %v3786_v42, 0 }
 0x218   : > { %2888 = vmatmul.mubr.msk.bf16.gmra.mrb[48].mxu1 %vm1993_vm6, %v3782_v28 }
 0x219   : > { %v2857_v27 = vpop.f32.mrb[28].mxu0 }
 0x21a   : > { %v2616_v20 = vpack.c.bf16 %v2857_v27, %v2857_v27  ;;  %v1721_v34 = vpop.f32.mrb[29].mxu0 }
 0x21b   : > { %v2614_v33 = vpack.c.bf16 %v1721_v34, %v1721_v34  ;;  %v2858_v48 = vpop.f32.mrb[30].mxu0 }
 0x21c   : > { %1955 = vst.msk [vmem:[%s3762_s28 + $0x28] sm:$0xf] %vm1944_vm5, %v2616_v20  ;;  %v3798_v17 = vpack.c.bf16 %v2858_v48, %v2857_v27  ;;  %v2617_v0 = vpack.c.bf16 %v2858_v48, %v2858_v48  ;;  %v1724_v44 = vpop.f32.mrb[31].mxu0  ;;  %v2004_v27 = vsel %vm1993_vm6, %v3782_v28, 0  ;;  %v2236_v20 = vld [vmem:[%s4021_s7] sm:$0x3] }
 0x21d   : > { %1953 = vst.msk [vmem:[%s3762_s28 + $0x20] sm:$0xf] %vm1944_vm5, %v2614_v33  ;;  %v3802_v56 = vpack.c.bf16 %v1724_v44, %v1721_v34  ;;  %v2615_v11 = vpack.c.bf16 %v1724_v44, %v1724_v44 }
 0x21e   : > { %1956 = vst.msk [vmem:[%s3762_s28 + $0x2c] sm:$0xf] %vm1944_vm5, %v2617_v0  ;;  %v2010_v28 = vsel %vm1993_vm6, %v3798_v17, 0 }
 0x21f   : > { %1954 = vst.msk [vmem:[%s3762_s28 + $0x24] sm:$0xf] %vm1944_vm5, %v2615_v11  ;;  %2891 = vmatprep.mubr.msk.bf16.mxu1 %vm1993_vm6, %v3802_v56  ;;  %v2007_v34 = vsel %vm1993_vm6, %v3802_v56, 0 }
 0x220   : > { %2892 = vmatmul.mubr.msk.bf16.gmra.mrb[52].mxu1 %vm1993_vm6, %v3798_v17 }
 0x221   : > { %v2861_v50 = vpop.f32.mrb[32].mxu0 }
 0x222   : > { %v2620_v15 = vpack.c.bf16 %v2861_v50, %v2861_v50  ;;  %v1737_v36 = vpop.f32.mrb[33].mxu0 }
 0x223   : > { %v2618_v1 = vpack.c.bf16 %v1737_v36, %v1737_v36  ;;  %v2862_v51 = vpop.f32.mrb[34].mxu0 }
 0x224   : > { %1959 = vst.msk [vmem:[%s3762_s28 + $0x38] sm:$0xf] %vm1944_vm5, %v2620_v15  ;;  %v3814_v21 = vpack.c.bf16 %v2862_v51, %v2861_v50  ;;  %v2621_v39 = vpack.c.bf16 %v2862_v51, %v2862_v51  ;;  %v1740_v40 = vpop.f32.mrb[35].mxu0 }
 0x225   : > { %1957 = vst.msk [vmem:[%s3762_s28 + $0x30] sm:$0xf] %vm1944_vm5, %v2618_v1  ;;  %v3818_v59 = vpack.c.bf16 %v1740_v40, %v1737_v36  ;;  %v2619_v41 = vpack.c.bf16 %v1740_v40, %v1740_v40 }
 0x226   : > { %1960 = vst.msk [vmem:[%s3762_s28 + $0x3c] sm:$0xf] %vm1944_vm5, %v2621_v39  ;;  %v2016_v48 = vsel %vm1993_vm6, %v3814_v21, 0 }
 0x227   : > { %1958 = vst.msk [vmem:[%s3762_s28 + $0x34] sm:$0xf] %vm1944_vm5, %v2619_v41  ;;  %2895 = vmatprep.mubr.msk.bf16.mxu1 %vm1993_vm6, %v3818_v59  ;;  %v2013_v33 = vsel %vm1993_vm6, %v3818_v59, 0 }
 0x228   : > { %2896 = vmatmul.mubr.msk.bf16.gmra.mrb[56].mxu1 %vm1993_vm6, %v3814_v21 }
 0x229   : > { %v2865_v43 = vpop.f32.mrb[36].mxu0 }
 0x22a   : > { %v2624_v19 = vpack.c.bf16 %v2865_v43, %v2865_v43  ;;  %v1753_v6 = vpop.f32.mrb[37].mxu0 }
 0x22b   : > { %v2622_v16 = vpack.c.bf16 %v1753_v6, %v1753_v6  ;;  %v2866_v47 = vpop.f32.mrb[38].mxu0 }
 0x22c   : > { %1963 = vst.msk [vmem:[%s3762_s28 + $0x48] sm:$0xf] %vm1944_vm5, %v2624_v19  ;;  %v1825_v45 = vpack.c.bf16 %v2866_v47, %v2865_v43  ;;  %v2625_v9 = vpack.c.bf16 %v2866_v47, %v2866_v47  ;;  %v1756_v62 = vpop.f32.mrb[39].mxu0 }
 0x22d   : > { %1961 = vst.msk [vmem:[%s3762_s28 + $0x40] sm:$0xf] %vm1944_vm5, %v2622_v16  ;;  %v1824_v52 = vpack.c.bf16 %v1756_v62, %v1753_v6  ;;  %v2623_v13 = vpack.c.bf16 %v1756_v62, %v1756_v62 }
 0x22e   : > { %1964 = vst.msk [vmem:[%s3762_s28 + $0x4c] sm:$0xf] %vm1944_vm5, %v2625_v9 }
 0x22f   : > { %1962 = vst.msk [vmem:[%s3762_s28 + $0x44] sm:$0xf] %vm1944_vm5, %v2623_v13  ;;  %2899 = vmatprep.mubr.msk.bf16.mxu1 %vm1993_vm6, %v1824_v52  ;;  %2952 = vmatprep.subr.msk.bf16.mxu1 %vm1993_vm6, %v1824_v52 }
 0x230   : > { %2900 = vmatmul.mubr.msk.bf16.gmra.mrb[60].mxu1 %vm1993_vm6, %v1825_v45 }
 0x231   : > { %2726 = vmatpush3.bf16.xpose.msra.mxu1 %v1995_v60  ;;  %v2869_v46 = vpop.f32.mrb[40].mxu0 }
 0x232   : > { %v2628_v58 = vpack.c.bf16 %v2869_v46, %v2869_v46  ;;  %2953 = vmatprep.subr.msk.bf16.mxu1 %vm1993_vm6, %v1825_v45  ;;  %v1769_v49 = vpop.f32.mrb[41].mxu0 }
 0x233   : > { %v2626_v25 = vpack.c.bf16 %v1769_v49, %v1769_v49  ;;  %v2870_v2 = vpop.f32.mrb[42].mxu0 }
 0x234   : > { %1967 = vst.msk [vmem:[%s3762_s28 + $0x58] sm:$0xf] %vm1944_vm5, %v2628_v58  ;;  %v1827_v57 = vpack.c.bf16 %v2870_v2, %v2869_v46  ;;  %v2629_v29 = vpack.c.bf16 %v2870_v2, %v2870_v2  ;;  %v1772_v4 = vpop.f32.mrb[43].mxu0 }
 0x235   : > { %1965 = vst.msk [vmem:[%s3762_s28 + $0x50] sm:$0xf] %vm1944_vm5, %v2626_v25  ;;  %v1826_v8 = vpack.c.bf16 %v1772_v4, %v1769_v49  ;;  %v2627_v7 = vpack.c.bf16 %v1772_v4, %v1772_v4 }
 0x236   : > { %1968 = vst.msk [vmem:[%s3762_s28 + $0x5c] sm:$0xf] %vm1944_vm5, %v2629_v29 }
 0x237   : > { %1966 = vst.msk [vmem:[%s3762_s28 + $0x54] sm:$0xf] %vm1944_vm5, %v2627_v7  ;;  %2903 = vmatprep.mubr.msk.bf16.mxu1 %vm1993_vm6, %v1826_v8 }
 0x238   : > { %2904 = vmatmul.mubr.msk.bf16.gmra.mrb[64].mxu1 %vm1993_vm6, %v1827_v57 }
 0x239   : > { %2728 = vmatpush3.bf16.xpose.msra.mxu1 %v1998_v32  ;;  %v2873_v55 = vpop.f32.mrb[44].mxu0 }
 0x23a   : > { %2954 = vmatprep.subr.msk.bf16.mxu1 %vm1993_vm6, %v1826_v8  ;;  %v2632_v10 = vpack.c.bf16 %v2873_v55, %v2873_v55  ;;  %v1785_v22 = vpop.f32.mrb[45].mxu0 }
 0x23b   : > { %v2630_v24 = vpack.c.bf16 %v1785_v22, %v1785_v22  ;;  %v2874_v30 = vpop.f32.mrb[46].mxu0 }
 0x23c   : > { %1971 = vst.msk [vmem:[%s3762_s28 + $0x68] sm:$0xf] %vm1944_vm5, %v2632_v10  ;;  %v1829_v54 = vpack.c.bf16 %v2874_v30, %v2873_v55  ;;  %v2633_v38 = vpack.c.bf16 %v2874_v30, %v2874_v30  ;;  %v1788_v3 = vpop.f32.mrb[47].mxu0 }
 0x23d   : > { %1969 = vst.msk [vmem:[%s3762_s28 + $0x60] sm:$0xf] %vm1944_vm5, %v2630_v24  ;;  %v1828_v26 = vpack.c.bf16 %v1788_v3, %v1785_v22  ;;  %v2631_v35 = vpack.c.bf16 %v1788_v3, %v1788_v3 }
 0x23e   : > { %1972 = vst.msk [vmem:[%s3762_s28 + $0x6c] sm:$0xf] %vm1944_vm5, %v2633_v38 }
 0x23f   : > { %1970 = vst.msk [vmem:[%s3762_s28 + $0x64] sm:$0xf] %vm1944_vm5, %v2631_v35  ;;  %2907 = vmatprep.mubr.msk.bf16.mxu1 %vm1993_vm6, %v1828_v26 }
 0x240   : > { %2908 = vmatmul.mubr.msk.bf16.gmra.mrb[68].mxu1 %vm1993_vm6, %v1829_v54 }
 0x241   : > { %2730 = vmatpush3.bf16.xpose.msra.mxu1 %v2001_v14  ;;  %v2877_v61 = vpop.f32.mrb[48].mxu0 }
 0x242   : > { %2955 = vmatprep.subr.msk.bf16.mxu1 %vm1993_vm6, %v1827_v57  ;;  %v2636_v23 = vpack.c.bf16 %v2877_v61, %v2877_v61  ;;  %v1801_v53 = vpop.f32.mrb[49].mxu0 }
 0x243   : > { %v2634_v5 = vpack.c.bf16 %v1801_v53, %v1801_v53  ;;  %v2878_v37 = vpop.f32.mrb[50].mxu0 }
 0x244   : > { %1975 = vst.msk [vmem:[%s3762_s28 + $0x78] sm:$0xf] %vm1944_vm5, %v2636_v23  ;;  %v1831_v12 = vpack.c.bf16 %v2878_v37, %v2877_v61  ;;  %v2637_v18 = vpack.c.bf16 %v2878_v37, %v2878_v37  ;;  %v1804_v31 = vpop.f32.mrb[51].mxu0 }
 0x245   : > { %1973 = vst.msk [vmem:[%s3762_s28 + $0x70] sm:$0xf] %vm1944_vm5, %v2634_v5  ;;  %v1830_v42 = vpack.c.bf16 %v1804_v31, %v1801_v53  ;;  %v2635_v63 = vpack.c.bf16 %v1804_v31, %v1804_v31 }
 0x246   : > { %1976 = vst.msk [vmem:[%s3762_s28 + $0x7c] sm:$0xf] %vm1944_vm5, %v2637_v18 }
 0x247   : > { %1974 = vst.msk [vmem:[%s3762_s28 + $0x74] sm:$0xf] %vm1944_vm5, %v2635_v63  ;;  %2911 = vmatprep.mubr.msk.bf16.mxu1 %vm1993_vm6, %v1830_v42  ;;  %s2319_s28 = sshll.u32 %s384_s26, 4  ;;  %s3974_s28 = int_to_ptr.vmem [resolvable:$true] %s2319_s28 }
 0x248   : > { %2912 = vmatmul.mubr.msk.bf16.gmra.mrb[72].mxu1 %vm1993_vm6, %v1831_v12  ;;  %s3098_s17 = scalar_lea.vmem %s3974_s28, 128 }
 0x249   : > { %2732 = vmatpush3.bf16.xpose.msra.mxu1 %v2004_v27  ;;  %2741 = vmatprep.mubr.msk.bf16.mxu1 %vm1993_vm6, %v2236_v20  ;;  %p3099_p11 = scmp.ne.s32.totalorder %s3974_s28, %s3098_s17 }
 0x24a   : > { %2956 = vmatprep.subr.msk.bf16.mxu1 %vm1993_vm6, %v1828_v26 }
 0x24b   : > { %p3100_p12 = pnand %p3099_p11, %p3256_p5 }
 0x24d   : > { %p3101_p13 = pneg %p3100_p12 }
 0x251   : > { %2734 = vmatpush3.bf16.xpose.msra.mxu1 %v2007_v34 }
 0x252   : > { %2957 = vmatprep.subr.msk.bf16.mxu1 %vm1993_vm6, %v1829_v54 }
 0x259   : > { %2736 = vmatpush3.bf16.xpose.msra.mxu1 %v2010_v28 }
 0x25a   : > { %2958 = vmatprep.subr.msk.bf16.mxu1 %vm1993_vm6, %v1830_v42 }
 0x261   : > { %2738 = vmatpush3.bf16.xpose.msra.mxu1 %v2013_v33 }
 0x262   : > { %2959 = vmatprep.subr.msk.bf16.mxu1 %vm1993_vm6, %v1831_v12 }
 0x269   : > { %2740 = vmatpush3.bf16.xpose.msra.mxu1 %v2016_v48 }
 0x270   : > { %2742 = vmatmul.mubr.msk.bf16.vlgmr.msra.gmra.mrb[76].mxu1 %vm1993_vm6, %v2236_v20 }
 0x2e3   : > { %v2885_v17 = vpop.f32.mrb[44].mxu1 }
 0x2e4   : > { %2206 = vst.msk [vmem:[%s3901_s20 + $0x10] sm:$0xff] %vm2203_vm7, %v2885_v17  ;;  %v2076_v0 = vpop.f32.mrb[45].mxu1 }
 0x2e5   : > { %2204 = vst.msk [vmem:[%s3901_s20] sm:$0xff] %vm2203_vm7, %v2076_v0  ;;  %v2886_v44 = vpop.f32.mrb[46].mxu1 }
 0x2e6   : > { %2207 = vst.msk [vmem:[%s3901_s20 + $0x18] sm:$0xff] %vm2203_vm7, %v2886_v44  ;;  %v2079_v56 = vpop.f32.mrb[47].mxu1 }
 0x2e7   : > { %2205 = vst.msk [vmem:[%s3901_s20 + $0x8] sm:$0xff] %vm2203_vm7, %v2079_v56 }
 0x2eb   : > { %v2889_v11 = vpop.f32.mrb[48].mxu1 }
 0x2ec   : > { %2210 = vst.msk [vmem:[%s3901_s20 + $0x30] sm:$0xff] %vm2203_vm7, %v2889_v11  ;;  %v2092_v50 = vpop.f32.mrb[49].mxu1 }
 0x2ed   : > { %2208 = vst.msk [vmem:[%s3901_s20 + $0x20] sm:$0xff] %vm2203_vm7, %v2092_v50  ;;  %v2890_v15 = vpop.f32.mrb[50].mxu1 }
 0x2ee   : > { %2211 = vst.msk [vmem:[%s3901_s20 + $0x38] sm:$0xff] %vm2203_vm7, %v2890_v15  ;;  %v2095_v36 = vpop.f32.mrb[51].mxu1 }
 0x2ef   : > { %2209 = vst.msk [vmem:[%s3901_s20 + $0x28] sm:$0xff] %vm2203_vm7, %v2095_v36 }
 0x2f3   : > { %v2893_v1 = vpop.f32.mrb[52].mxu1 }
 0x2f4   : > { %2214 = vst.msk [vmem:[%s3901_s20 + $0x50] sm:$0xff] %vm2203_vm7, %v2893_v1  ;;  %v2108_v51 = vpop.f32.mrb[53].mxu1 }
 0x2f5   : > { %2212 = vst.msk [vmem:[%s3901_s20 + $0x40] sm:$0xff] %vm2203_vm7, %v2108_v51  ;;  %v2894_v21 = vpop.f32.mrb[54].mxu1 }
 0x2f6   : > { %2215 = vst.msk [vmem:[%s3901_s20 + $0x58] sm:$0xff] %vm2203_vm7, %v2894_v21  ;;  %v2111_v39 = vpop.f32.mrb[55].mxu1 }
 0x2f7   : > { %2213 = vst.msk [vmem:[%s3901_s20 + $0x48] sm:$0xff] %vm2203_vm7, %v2111_v39 }
 0x2fb   : > { %v2897_v40 = vpop.f32.mrb[56].mxu1 }
 0x2fc   : > { %2218 = vst.msk [vmem:[%s3901_s20 + $0x70] sm:$0xff] %vm2203_vm7, %v2897_v40  ;;  %v2124_v59 = vpop.f32.mrb[57].mxu1 }
 0x2fd   : > { %2216 = vst.msk [vmem:[%s3901_s20 + $0x60] sm:$0xff] %vm2203_vm7, %v2124_v59  ;;  %v2898_v41 = vpop.f32.mrb[58].mxu1 }
 0x2fe   : > { %2219 = vst.msk [vmem:[%s3901_s20 + $0x78] sm:$0xff] %vm2203_vm7, %v2898_v41  ;;  %v2127_v43 = vpop.f32.mrb[59].mxu1 }
 0x2ff   : > { %2217 = vst.msk [vmem:[%s3901_s20 + $0x68] sm:$0xff] %vm2203_vm7, %v2127_v43 }
 0x303   : > { %v2901_v19 = vpop.f32.mrb[60].mxu1 }
 0x304   : > { %2222 = vst.msk [vmem:[%s3901_s20 + $0x90] sm:$0xff] %vm2203_vm7, %v2901_v19  ;;  %v2140_v6 = vpop.f32.mrb[61].mxu1 }
 0x305   : > { %2220 = vst.msk [vmem:[%s3901_s20 + $0x80] sm:$0xff] %vm2203_vm7, %v2140_v6  ;;  %v2902_v16 = vpop.f32.mrb[62].mxu1 }
 0x306   : > { %2223 = vst.msk [vmem:[%s3901_s20 + $0x98] sm:$0xff] %vm2203_vm7, %v2902_v16  ;;  %v2143_v47 = vpop.f32.mrb[63].mxu1 }
 0x307   : > { %2221 = vst.msk [vmem:[%s3901_s20 + $0x88] sm:$0xff] %vm2203_vm7, %v2143_v47 }
 0x30b   : > { %v2905_v45 = vpop.f32.mrb[64].mxu1 }
 0x30c   : > { %2226 = vst.msk [vmem:[%s3901_s20 + $0xb0] sm:$0xff] %vm2203_vm7, %v2905_v45  ;;  %v2156_v9 = vpop.f32.mrb[65].mxu1 }
 0x30d   : > { %2224 = vst.msk [vmem:[%s3901_s20 + $0xa0] sm:$0xff] %vm2203_vm7, %v2156_v9  ;;  %v2906_v62 = vpop.f32.mrb[66].mxu1 }
 0x30e   : > { %2227 = vst.msk [vmem:[%s3901_s20 + $0xb8] sm:$0xff] %vm2203_vm7, %v2906_v62  ;;  %v2159_v52 = vpop.f32.mrb[67].mxu1 }
 0x30f   : > { %2225 = vst.msk [vmem:[%s3901_s20 + $0xa8] sm:$0xff] %vm2203_vm7, %v2159_v52 }
 0x313   : > { %v2909_v13 = vpop.f32.mrb[68].mxu1 }
 0x314   : > { %2230 = vst.msk [vmem:[%s3901_s20 + $0xd0] sm:$0xff] %vm2203_vm7, %v2909_v13  ;;  %v2172_v60 = vpop.f32.mrb[69].mxu1 }
 0x315   : > { %2228 = vst.msk [vmem:[%s3901_s20 + $0xc0] sm:$0xff] %vm2203_vm7, %v2172_v60  ;;  %v2910_v46 = vpop.f32.mrb[70].mxu1 }
 0x316   : > { %2231 = vst.msk [vmem:[%s3901_s20 + $0xd8] sm:$0xff] %vm2203_vm7, %v2910_v46  ;;  %v2175_v58 = vpop.f32.mrb[71].mxu1 }
 0x317   : > { %2229 = vst.msk [vmem:[%s3901_s20 + $0xc8] sm:$0xff] %vm2203_vm7, %v2175_v58 }
 0x31b   : > { %v2913_v49 = vpop.f32.mrb[72].mxu1 }
 0x31c   : > { %2234 = vst.msk [vmem:[%s3901_s20 + $0xf0] sm:$0xff] %vm2203_vm7, %v2913_v49  ;;  %v2188_v25 = vpop.f32.mrb[73].mxu1 }
 0x31d   : > { %2232 = vst.msk [vmem:[%s3901_s20 + $0xe0] sm:$0xff] %vm2203_vm7, %v2188_v25  ;;  %v2914_v2 = vpop.f32.mrb[74].mxu1 }
 0x31e   : > { %2235 = vst.msk [vmem:[%s3901_s20 + $0xf8] sm:$0xff] %vm2203_vm7, %v2914_v2  ;;  %v2191_v57 = vpop.f32.mrb[75].mxu1 }
 0x31f   : > { %2233 = vst.msk [vmem:[%s3901_s20 + $0xe8] sm:$0xff] %vm2203_vm7, %v2191_v57  ;;  %s3102_s20 = sshll.u32 %s3162_s18, 4  ;;  %s3103_s20 = int_to_ptr.vmem [resolvable:$false] %s3102_s20 }
 0x320   : > { %s3104_s21 = scalar_lea.vmem %s3103_s20, 256  ;;  %p3105_p0 = scmp.lt.s32.totalorder %s3974_s28, %s3103_s20 }
 0x321   : > { %p3106_p1 = scmp.lt.s32.totalorder %s3104_s21, %s3098_s17 }
 0x323   : > { %p3107_p2 = por %p3106_p1, %p3105_p0 }
 0x325   : > { %p3108_p3 = pnand %p3107_p2, %p3101_p13 }
 0x343   : > { %v2274_v29 = vpop.f32.mrb[76].mxu1 }
 0x344   : > { %v2276_v4 = vpop.f32.mrb[77].mxu1 }
 0x345   : > { %v2283_v8 = vcombine.low %v2274_v29, %v2276_v4  ;;  %v2278_v7 = vpop.f32.mrb[78].mxu1 }
 0x346   : > { %v2279_v32 = vpop.f32.mrb[79].mxu1 }
 0x347   : > { %2285 = vst [vmem:[%s384_s26] sm:$0xff] %v2283_v8 }
 0x348   : > { %3111 = shalt.err (!%p3108_p3)
}
 0x349   : > { %s3112_s27 = scalar_lea.hbm %s3972_s30, 128  ;;  %s3116_s12 = scalar_lea.hbm %s4024_s10, 512 }
 0x34a   : > { %p3113_p4 = scmp.ne.s32.totalorder %s3972_s30, %s3112_s27  ;;  %p3117_p9 = scmp.lt.u32.totalorder %s3972_s30, %s4024_s10 }
 0x34b   : > { %p3118_p10 = scmp.lt.u32.totalorder %s3116_s12, %s3112_s27  ;;  %p3120_p12 = scmp.lt.u32.totalorder %s3112_s27, %s3972_s30 }
 0x34c   : > { %p3114_p7 = pnand %p3113_p4, %p3256_p5 }
 0x34d   : > { %p3119_p11 = por %p3118_p10, %p3117_p9 }
 0x34e   : > { %p3115_p8 = pneg %p3114_p7 }
 0x34f   : > { %p3121_p13 = por %p3120_p12, %p3119_p11 }
 0x351   : > { %p3122_p0 = pnand %p3121_p13, %p3115_p8 }
 0x353   : > { %3125 = shalt.err (!%p3122_p0)
}
 0x354   : > { %2960 = dma.vmem_to_hbm [thread:$0]  (%p3256_p5), %s3974_s28, 128, %s3972_s30, %s2297_s11  }
 0x355 PF: > { %p2966_p1 = scmp.ge.s32.totalorder %s3160_s16, 2  ;;  %s2347_s17 = sand.u32 1, %s3148_s13  }
 0x356   : > { %s2348_s20 = scalar_lea.sflag [#allocation3], %s2347_s17 }
 0x357   : > { %p2963_p2 = pnand %p2966_p1, %p3260_p6 }
 0x359   : > { %3143 = dma.done.wait (!%p2963_p2), %s2348_s20, 128  }
 0x35a   : > { %3145 = vsyncadd (!%p2963_p2), %s2348_s20, 4294967168  ;;  %p21_p3 = scmp.ge.s32.totalorder %s3243_s19, 6   ;;  %s4030_s13 = smov %s3152_s14 }
 0x35b   : > { %s4031_s14 = smov %s3156_s15  ;;  %s4032_s15 = smov %s3254_s22 }
 0x35c   : > { %s4033_s16 = smov %s3243_s19  ;;  %23 = sbr.rel (!%p21_p3) target bundleno = 3 (0x3), region = 114 }
 0x363   :  { %2353 = vsyncpa [#allocation3], 1 }
 0x364   :  { %2355 = vsyncpa [#allocation3 + $0x1], 1 }

</bundles_post_ra>
